<compile_context>
chip_gen: v6e
topology: v6e:2x2x1
jax: 0.10.0
libtpu: 0.0.40
codegen_flags: <defaults>
</compile_context>

<pallas_src>
import functools

import jax
import jax.numpy as jnp
import numpy as np
from jax.experimental import pallas as pl
from jax.experimental.pallas import tpu as pltpu

EPS = 1e-5          # nn.InstanceNorm2d default eps
NEG_SLOPE = 0.2     # LeakyReLU negative_slope


def _round_up(x, m):
    return (x + m - 1) // m * m


def _down_kernel(x_ref, l_ref, r_ref, m_ref, g_ref, gt_ref,
                 w1_ref, b1_ref, w2_ref, b2_ref,
                 o_ref, im1_ref, im2_ref, *, images_per_step, img_w):
    # x_ref : (B*Cin, H*W)       B images, NCHW-native rows=(image, channel), lanes=flat spatial
    # l_ref : (B, Cpad1, B*Cin)  0/1 row-select+pad matrices (image b's channels -> rows 0..Cin-1)
    # r_ref : (B, H*W, B*P)      0/1 downsample matrices (pool anchors -> lane block b)
    # m_ref : (9, B*P)           0/1 border masks for the 9 conv taps (tiled over the B images)
    # g_ref : (B*P, B)           block-ones (per-image lane sums)        gt_ref: (B, B*P) transpose
    # w1_ref: (Cmid_p, 9*Cpad1)  conv1 weights, matmul-ready, zero-padded   b1_ref: (Cmid_p, 1)
    # w2_ref: (Cout_p, 9*Cmid_p) conv2 weights                              b2_ref: (Cout_p, 1)
    # o_ref : (Cout_p, B*P)      lane-dense output slab (one full (8,128) f32 tile at the demo size)
    # im1_ref/im2_ref: VMEM im2col scratch (9*Cpad1, B*P) / (9*Cmid_p, B*P)
    B = images_per_step
    W = img_w
    Wp = W // 2
    HW = x_ref.shape[1]
    BP = m_ref.shape[1]
    P = BP // B

    x = x_ref[...].astype(jnp.float32)                       # (B*Cin, H*W)

    # ---- MaxPool2d(2): elementwise max of the 4 window taps via lane rolls (XLU) ----
    # (H, W even => the 3 shifted taps of every 2x2 anchor stay inside the same row/image.)
    pm = x
    for off in (1, W, W + 1):
        pm = jnp.maximum(pm, pltpu.roll(x, shift=HW - off, axis=1))

    # ---- downsample + (image,chan)->(chan, image*spatial) relayout via exact 0/1 matmuls ----
    pooled = None                                             # -> (Cpad1, B*P), pad rows are 0
    for b in range(B):
        rows = jnp.dot(l_ref[b], pm, preferred_element_type=jnp.float32)      # (Cpad1, H*W)
        term = jnp.dot(rows, r_ref[b], preferred_element_type=jnp.float32)    # (Cpad1, B*P)
        pooled = term if pooled is None else pooled + term

    masks = m_ref[...]                                        # (9, B*P) 0/1

    def conv_in_lrelu(act, w_ref, b_ref, im_ref):
        cpad = act.shape[0]
        # im2col: 9 lane-rolled + border-masked copies, each a full (cpad, B*P) tile write.
        # Masked positions are exactly the out-of-image taps, so roll wrap-around /
        # cross-image leakage never reaches a live lane (implicit padding=1).
        for k in range(9):
            dh, dw = k // 3 - 1, k % 3 - 1
            off = dh * Wp + dw
            if off == 0:
                tap = act
            else:
                tap = pltpu.roll(act, shift=(-off) % BP, axis=1) * masks[k:k + 1, :]
            im_ref[pl.ds(k * cpad, cpad), :] = tap
        # Single K = 9*cpad conv matmul + bias.
        y = jnp.dot(w_ref[...], im_ref[...],
                    preferred_element_type=jnp.float32) + b_ref[...]          # (c_out_p, B*P)
        # InstanceNorm2d (affine=False): one-pass per-image moments via block-ones matmuls.
        s1 = jnp.dot(y, g_ref[...], preferred_element_type=jnp.float32)       # (c_out_p, B)
        s2 = jnp.dot(y * y, g_ref[...], preferred_element_type=jnp.float32)   # (c_out_p, B)
        mean = s1 * (1.0 / P)
        var = s2 * (1.0 / P) - mean * mean
        rstd = jax.lax.rsqrt(var + EPS)
        mean_bp = jnp.dot(mean, gt_ref[...], preferred_element_type=jnp.float32)  # (c_out_p, B*P)
        rstd_bp = jnp.dot(rstd, gt_ref[...], preferred_element_type=jnp.float32)
        yn = (y - mean_bp) * rstd_bp
        # LeakyReLU(0.2)
        return jnp.where(yn >= 0, yn, NEG_SLOPE * yn)

    y1 = conv_in_lrelu(pooled, w1_ref, b1_ref, im1_ref)       # (Cmid_p, B*P)
    y2 = conv_in_lrelu(y1, w2_ref, b2_ref, im2_ref)           # (Cout_p, B*P)
    o_ref[...] = y2.astype(o_ref.dtype)


def _down_constants(H, W, B, Cin, Cpad1):
    """Tiny host-side 0/1 constants (no O(P^2) matrices)."""
    Hp, Wp = H // 2, W // 2
    P, HW, BP = Hp * Wp, H * W, B * (H // 2) * (W // 2)

    q = np.arange(P)
    anchor = (2 * (q // Wp)) * W + 2 * (q % Wp)               # top-left pixel of each 2x2 window
    sel = (np.arange(HW)[:, None] == anchor[None, :]).astype(np.float32)      # (H*W, P)

    # R[b]: downsample image b's pooled-max slab into lane block b of (.., B*P)
    R = np.zeros((B, HW, BP), np.float32)
    for b in range(B):
        R[b, :, b * P:(b + 1) * P] = sel

    # L[b]: pick image b's Cin channel rows and zero-pad to Cpad1 rows (sublane tile)
    L = np.zeros((B, Cpad1, B * Cin), np.float32)
    for b in range(B):
        L[b, np.arange(Cin), b * Cin + np.arange(Cin)] = 1.0

    # border masks for the 9 conv taps, tiled across the B packed images
    pi, pj = q // Wp, q % Wp
    masks = np.zeros((9, BP), np.float32)
    for k in range(9):
        dh, dw = k // 3 - 1, k % 3 - 1
        valid = (pi + dh >= 0) & (pi + dh < Hp) & (pj + dw >= 0) & (pj + dw < Wp)
        masks[k] = np.tile(valid.astype(np.float32), B)

    # block-ones matrices for per-image InstanceNorm moments / broadcast-back
    g = np.zeros((BP, B), np.float32)
    gt = np.zeros((B, BP), np.float32)
    for b in range(B):
        g[b * P:(b + 1) * P, b] = 1.0
        gt[b, b * P:(b + 1) * P] = 1.0

    return (jnp.asarray(L), jnp.asarray(R), jnp.asarray(masks),
            jnp.asarray(g), jnp.asarray(gt))


def _prep_conv_weight(w_hwio, cin_pad, cout_pad):
    """HWIO (3,3,ci,co) -> matmul-ready (cout_pad, 9*cin_pad) with zero-padded channels."""
    kh, kw, ci, co = w_hwio.shape
    wt = jnp.transpose(w_hwio.reshape(kh * kw, ci, co), (2, 0, 1)).astype(jnp.float32)
    wp = jnp.zeros((cout_pad, kh * kw, cin_pad), jnp.float32).at[:co, :, :ci].set(wt)
    return wp.reshape(cout_pad, kh * kw * cin_pad)


def _prep_bias(b, cout_pad):
    return jnp.zeros((cout_pad, 1), jnp.float32).at[:b.shape[0], 0].set(b.astype(jnp.float32))


def _pick_images_per_step(N, Cin, P):
    # Smallest divisor B of N whose packed lane width B*P is a multiple of 128 and whose
    # input row block B*Cin is a multiple of the 8-sublane tile; fall back to B = N
    # (full-array blocks are always BlockSpec-legal).
    for B in range(1, N):
        if N % B == 0 and (B * P) % 128 == 0 and (B * Cin) % 8 == 0:
            return B
    return N


def down_forward(x_nchw, w1, b1, w2, b2):
    """Down.forward: (N, Cin, H, W) -> (N, Cout, H//2, W//2). Conv weights are HWIO."""
    N, Cin, H, W = x_nchw.shape
    assert H % 2 == 0 and W % 2 == 0, "MaxPool2d(2) assumes even spatial dims"
    Hp, Wp = H // 2, W // 2
    P = Hp * Wp
    Cmid, Cout = w1.shape[3], w2.shape[3]
    assert w1.shape[:3] == (3, 3, Cin) and w2.shape[:3] == (3, 3, Cmid)

    B = _pick_images_per_step(N, Cin, P)     # images packed per grid step
    BP = B * P
    Cpad1 = _round_up(Cin, 8)                # conv1 per-tap channel block (full sublane tiles)
    Cmid_p = _round_up(Cmid, 8)              # conv1 output rows == conv2 per-tap channel block
    Cout_p = _round_up(Cout, 8)              # output rows (padded channels come out exactly 0)

    x_flat = x_nchw.reshape(N * Cin, H * W)  # free reshape of NCHW
    L, R, masks, g, gt = _down_constants(H, W, B, Cin, Cpad1)
    wm1 = _prep_conv_weight(w1, Cpad1, Cmid_p)
    wm2 = _prep_conv_weight(w2, Cmid_p, Cout_p)
    b1c = _prep_bias(b1, Cmid_p)
    b2c = _prep_bias(b2, Cout_p)

    kernel = functools.partial(_down_kernel, images_per_step=B, img_w=W)

    out_flat = pl.pallas_call(
        kernel,
        out_shape=jax.ShapeDtypeStruct((Cout_p, N * P), x_nchw.dtype),
        grid_spec=pltpu.PrefetchScalarGridSpec(
            num_scalar_prefetch=0,
            grid=(N // B,),
            in_specs=[
                pl.BlockSpec((B * Cin, H * W), lambda i: (i, 0)),
                pl.BlockSpec((B, Cpad1, B * Cin), lambda i: (0, 0, 0)),  # resident constants
                pl.BlockSpec((B, H * W, BP), lambda i: (0, 0, 0)),
                pl.BlockSpec((9, BP), lambda i: (0, 0)),
                pl.BlockSpec((BP, B), lambda i: (0, 0)),
                pl.BlockSpec((B, BP), lambda i: (0, 0)),
                pl.BlockSpec((Cmid_p, 9 * Cpad1), lambda i: (0, 0)),
                pl.BlockSpec((Cmid_p, 1), lambda i: (0, 0)),
                pl.BlockSpec((Cout_p, 9 * Cmid_p), lambda i: (0, 0)),
                pl.BlockSpec((Cout_p, 1), lambda i: (0, 0)),
            ],
            out_specs=pl.BlockSpec((Cout_p, BP), lambda i: (0, i)),
            scratch_shapes=[
                pltpu.VMEM((9 * Cpad1, BP), jnp.float32),
                pltpu.VMEM((9 * Cmid_p, BP), jnp.float32),
            ],
        ),
        compiler_params=pltpu.CompilerParams(
            dimension_semantics=("parallel",),          # batch steps are independent
            vmem_limit_bytes=32 * 1024 * 1024,          # explicit; fits v5e/v6e/v7x budgets
        ),
    )(x_flat, L, R, masks, g, gt, wm1, b1c, wm2, b2c)

    # (Cout, N*P) lane-dense slab -> NCHW; tiny output-sized transpose done by XLA.
    out = out_flat[:Cout].reshape(Cout, N, Hp, Wp)
    return jnp.transpose(out, (1, 0, 2, 3))


# ---------------- pure-JAX reference (for correctness check) ----------------
def _ref_down(x, w1, b1, w2, b2):
    N, C, H, W = x.shape
    xp = x.reshape(N, C, H // 2, 2, W // 2, 2).max(axis=(3, 5))  # MaxPool2d(2)

    def block(y, w, b):
        y = jax.lax.conv_general_dilated(
            y, w, window_strides=(1, 1), padding=((1, 1), (1, 1)),
            dimension_numbers=("NCHW", "HWIO", "NCHW"),
            precision=jax.lax.Precision.HIGHEST)
        y = y + b[None, :, None, None]
        mean = y.mean(axis=(2, 3), keepdims=True)
        var = ((y - mean) ** 2).mean(axis=(2, 3), keepdims=True)
        y = (y - mean) / jnp.sqrt(var + EPS)
        return jnp.where(y >= 0, y, NEG_SLOPE * y)

    return block(block(xp, w1, b1), w2, b2)


if __name__ == "__main__":
    # Down(in_channels=4, out_channels=8) on a (4, 4, 16, 16) NCHW input
    # (N=4 so that, with 2 images packed per step, the batch grid still has 2 steps).
    N, Cin, H, W = 4, 4, 16, 16
    Cmid = Cout = 8  # DoubleConv: mid_channels defaults to out_channels

    key = jax.random.PRNGKey(0)
    kx, k1, k2, k3, k4 = jax.random.split(key, 5)
    x = jax.random.normal(kx, (N, Cin, H, W), dtype=jnp.float32)
    # deterministic synthetic parameters (HWIO weight layout)
    w1 = jax.random.normal(k1, (3, 3, Cin, Cmid), dtype=jnp.float32) * 0.2
    b1 = jax.random.normal(k2, (Cmid,), dtype=jnp.float32) * 0.1
    w2 = jax.random.normal(k3, (3, 3, Cmid, Cout), dtype=jnp.float32) * 0.2
    b2 = jax.random.normal(k4, (Cout,), dtype=jnp.float32) * 0.1

    out = jax.block_until_ready(down_forward(x, w1, b1, w2, b2))
    ref = jax.block_until_ready(_ref_down(x, w1, b1, w2, b2))

    assert out.shape == (N, Cout, H // 2, W // 2), out.shape
    np.testing.assert_allclose(np.asarray(out), np.asarray(ref), rtol=1e-4, atol=1e-4)
    print("KERNEL_OK")
</pallas_src>

<mosaic_0001>
module attributes {stable_mosaic.version = 11 : i64} {
  func.func @_down_kernel(%arg0: i32, %arg1: memref<8x256xf32, #tpu.memory_space<vmem>>, %arg2: memref<2x8x8xf32, #tpu.memory_space<vmem>>, %arg3: memref<2x256x128xf32, #tpu.memory_space<vmem>>, %arg4: memref<9x128xf32, #tpu.memory_space<vmem>>, %arg5: memref<128x2xf32, #tpu.memory_space<vmem>>, %arg6: memref<2x128xf32, #tpu.memory_space<vmem>>, %arg7: memref<8x72xf32, #tpu.memory_space<vmem>>, %arg8: memref<8x1xf32, #tpu.memory_space<vmem>>, %arg9: memref<8x72xf32, #tpu.memory_space<vmem>>, %arg10: memref<8x1xf32, #tpu.memory_space<vmem>>, %arg11: memref<8x128xf32, #tpu.memory_space<vmem>>, %arg12: memref<72x128xf32, #tpu.memory_space<vmem>>, %arg13: memref<72x128xf32, #tpu.memory_space<vmem>>) attributes {dimension_semantics = [#tpu.dimension_semantics<parallel>], iteration_bounds = array<i64: 2>, scalar_prefetch = 0 : i64, scratch_operands = 2 : i64, tpu.core_type = #tpu.core_type<tc>, window_params = [{transform_indices = @transform_0, window_bounds = array<i64: 8, 256>}, {pipeline_mode = #tpu.pipeline_mode<synchronous>, transform_indices = @transform_1, window_bounds = array<i64: 2, 8, 8>}, {pipeline_mode = #tpu.pipeline_mode<synchronous>, transform_indices = @transform_2, window_bounds = array<i64: 2, 256, 128>}, {pipeline_mode = #tpu.pipeline_mode<synchronous>, transform_indices = @transform_3, window_bounds = array<i64: 9, 128>}, {pipeline_mode = #tpu.pipeline_mode<synchronous>, transform_indices = @transform_4, window_bounds = array<i64: 128, 2>}, {pipeline_mode = #tpu.pipeline_mode<synchronous>, transform_indices = @transform_5, window_bounds = array<i64: 2, 128>}, {pipeline_mode = #tpu.pipeline_mode<synchronous>, transform_indices = @transform_6, window_bounds = array<i64: 8, 72>}, {pipeline_mode = #tpu.pipeline_mode<synchronous>, transform_indices = @transform_7, window_bounds = array<i64: 8, 1>}, {pipeline_mode = #tpu.pipeline_mode<synchronous>, transform_indices = @transform_8, window_bounds = array<i64: 8, 72>}, {pipeline_mode = #tpu.pipeline_mode<synchronous>, transform_indices = @transform_9, window_bounds = array<i64: 8, 1>}, {transform_indices = @transform_10, window_bounds = array<i64: 8, 128>}]} {
    %c0 = arith.constant 0 : index
    %c0_0 = arith.constant 0 : index
    %0 = vector.load %arg1[%c0, %c0_0] : memref<8x256xf32, #tpu.memory_space<vmem>>, vector<8x256xf32>
    %c255_i32 = arith.constant 255 : i32
    %1 = tpu.dynamic_rotate %0 by %c255_i32 dim 1 : vector<8x256xf32>, i32 -> vector<8x256xf32>
    %2 = arith.maximumf %0, %1 : vector<8x256xf32>
    %c240_i32 = arith.constant 240 : i32
    %3 = tpu.dynamic_rotate %0 by %c240_i32 dim 1 : vector<8x256xf32>, i32 -> vector<8x256xf32>
    %4 = arith.maximumf %2, %3 : vector<8x256xf32>
    %c239_i32 = arith.constant 239 : i32
    %5 = tpu.dynamic_rotate %0 by %c239_i32 dim 1 : vector<8x256xf32>, i32 -> vector<8x256xf32>
    %6 = arith.maximumf %4, %5 : vector<8x256xf32>
    %c0_1 = arith.constant 0 : index
    %c0_2 = arith.constant 0 : index
    %c0_3 = arith.constant 0 : index
    %7 = vector.load %arg2[%c0_1, %c0_2, %c0_3] : memref<2x8x8xf32, #tpu.memory_space<vmem>>, vector<1x8x8xf32>
    %8 = vector.shape_cast %7 : vector<1x8x8xf32> to vector<8x8xf32>
    %cst = arith.constant dense<0.000000e+00> : vector<8x256xf32>
    %9 = tpu.matmul %8, %6, %cst {dimension_numbers = #tpu.dot_dimension_numbers<[1], [0], [0], [1], [0, 0, 1, 1], [], []>} : vector<8x8xf32>, vector<8x256xf32>, vector<8x256xf32> -> vector<8x256xf32>
    %c0_4 = arith.constant 0 : index
    %c0_5 = arith.constant 0 : index
    %c0_6 = arith.constant 0 : index
    %10 = vector.load %arg3[%c0_4, %c0_5, %c0_6] : memref<2x256x128xf32, #tpu.memory_space<vmem>>, vector<1x256x128xf32>
    %11 = vector.shape_cast %10 : vector<1x256x128xf32> to vector<256x128xf32>
    %cst_7 = arith.constant dense<0.000000e+00> : vector<8x128xf32>
    %12 = tpu.matmul %9, %11, %cst_7 {dimension_numbers = #tpu.dot_dimension_numbers<[1], [0], [0], [1], [0, 0, 1, 1], [], []>} : vector<8x256xf32>, vector<256x128xf32>, vector<8x128xf32> -> vector<8x128xf32>
    %c1 = arith.constant 1 : index
    %c0_8 = arith.constant 0 : index
    %c0_9 = arith.constant 0 : index
    %13 = vector.load %arg2[%c1, %c0_8, %c0_9] : memref<2x8x8xf32, #tpu.memory_space<vmem>>, vector<1x8x8xf32>
    %14 = vector.shape_cast %13 : vector<1x8x8xf32> to vector<8x8xf32>
    %cst_10 = arith.constant dense<0.000000e+00> : vector<8x256xf32>
    %15 = tpu.matmul %14, %6, %cst_10 {dimension_numbers = #tpu.dot_dimension_numbers<[1], [0], [0], [1], [0, 0, 1, 1], [], []>} : vector<8x8xf32>, vector<8x256xf32>, vector<8x256xf32> -> vector<8x256xf32>
    %c1_11 = arith.constant 1 : index
    %c0_12 = arith.constant 0 : index
    %c0_13 = arith.constant 0 : index
    %16 = vector.load %arg3[%c1_11, %c0_12, %c0_13] : memref<2x256x128xf32, #tpu.memory_space<vmem>>, vector<1x256x128xf32>
    %17 = vector.shape_cast %16 : vector<1x256x128xf32> to vector<256x128xf32>
    %cst_14 = arith.constant dense<0.000000e+00> : vector<8x128xf32>
    %18 = tpu.matmul %15, %17, %cst_14 {dimension_numbers = #tpu.dot_dimension_numbers<[1], [0], [0], [1], [0, 0, 1, 1], [], []>} : vector<8x256xf32>, vector<256x128xf32>, vector<8x128xf32> -> vector<8x128xf32>
    %19 = arith.addf %12, %18 : vector<8x128xf32>
    %c0_15 = arith.constant 0 : index
    %c0_16 = arith.constant 0 : index
    %20 = vector.load %arg4[%c0_15, %c0_16] : memref<9x128xf32, #tpu.memory_space<vmem>>, vector<9x128xf32>
    %c9_i32 = arith.constant 9 : i32
    %21 = tpu.dynamic_rotate %19 by %c9_i32 dim 1 : vector<8x128xf32>, i32 -> vector<8x128xf32>
    %22 = vector.extract_strided_slice %20 {offsets = [0, 0], sizes = [1, 128], strides = [1, 1]} : vector<9x128xf32> to vector<1x128xf32>
    %23 = vector.broadcast %22 : vector<1x128xf32> to vector<8x128xf32>
    %24 = arith.mulf %21, %23 : vector<8x128xf32>
    %c0_17 = arith.constant 0 : index
    %c0_18 = arith.constant 0 : index
    %25 = vector.load %arg12[%c0_17, %c0_18] : memref<72x128xf32, #tpu.memory_space<vmem>>, vector<8x128xf32>
    tpu.vector_store %arg12[%c0_17, %c0_18], %24 {strides = array<i32>} : memref<72x128xf32, #tpu.memory_space<vmem>>, vector<8x128xf32>,
    %c8_i32 = arith.constant 8 : i32
    %26 = tpu.dynamic_rotate %19 by %c8_i32 dim 1 : vector<8x128xf32>, i32 -> vector<8x128xf32>
    %27 = vector.extract_strided_slice %20 {offsets = [1, 0], sizes = [1, 128], strides = [1, 1]} : vector<9x128xf32> to vector<1x128xf32>
    %28 = vector.broadcast %27 : vector<1x128xf32> to vector<8x128xf32>
    %29 = arith.mulf %26, %28 : vector<8x128xf32>
    %c8 = arith.constant 8 : index
    %c0_19 = arith.constant 0 : index
    %30 = vector.load %arg12[%c8, %c0_19] : memref<72x128xf32, #tpu.memory_space<vmem>>, vector<8x128xf32>
    tpu.vector_store %arg12[%c8, %c0_19], %29 {strides = array<i32>} : memref<72x128xf32, #tpu.memory_space<vmem>>, vector<8x128xf32>,
    %c7_i32 = arith.constant 7 : i32
    %31 = tpu.dynamic_rotate %19 by %c7_i32 dim 1 : vector<8x128xf32>, i32 -> vector<8x128xf32>
    %32 = vector.extract_strided_slice %20 {offsets = [2, 0], sizes = [1, 128], strides = [1, 1]} : vector<9x128xf32> to vector<1x128xf32>
    %33 = vector.broadcast %32 : vector<1x128xf32> to vector<8x128xf32>
    %34 = arith.mulf %31, %33 : vector<8x128xf32>
    %c16 = arith.constant 16 : index
    %c0_20 = arith.constant 0 : index
    %35 = vector.load %arg12[%c16, %c0_20] : memref<72x128xf32, #tpu.memory_space<vmem>>, vector<8x128xf32>
    tpu.vector_store %arg12[%c16, %c0_20], %34 {strides = array<i32>} : memref<72x128xf32, #tpu.memory_space<vmem>>, vector<8x128xf32>,
    %c1_i32 = arith.constant 1 : i32
    %36 = tpu.dynamic_rotate %19 by %c1_i32 dim 1 : vector<8x128xf32>, i32 -> vector<8x128xf32>
    %37 = vector.extract_strided_slice %20 {offsets = [3, 0], sizes = [1, 128], strides = [1, 1]} : vector<9x128xf32> to vector<1x128xf32>
    %38 = vector.broadcast %37 : vector<1x128xf32> to vector<8x128xf32>
    %39 = arith.mulf %36, %38 : vector<8x128xf32>
    %c24 = arith.constant 24 : index
    %c0_21 = arith.constant 0 : index
    %40 = vector.load %arg12[%c24, %c0_21] : memref<72x128xf32, #tpu.memory_space<vmem>>, vector<8x128xf32>
    tpu.vector_store %arg12[%c24, %c0_21], %39 {strides = array<i32>} : memref<72x128xf32, #tpu.memory_space<vmem>>, vector<8x128xf32>,
    %c32 = arith.constant 32 : index
    %c0_22 = arith.constant 0 : index
    %41 = vector.load %arg12[%c32, %c0_22] : memref<72x128xf32, #tpu.memory_space<vmem>>, vector<8x128xf32>
    tpu.vector_store %arg12[%c32, %c0_22], %19 {strides = array<i32>} : memref<72x128xf32, #tpu.memory_space<vmem>>, vector<8x128xf32>,
    %c127_i32 = arith.constant 127 : i32
    %42 = tpu.dynamic_rotate %19 by %c127_i32 dim 1 : vector<8x128xf32>, i32 -> vector<8x128xf32>
    %43 = vector.extract_strided_slice %20 {offsets = [5, 0], sizes = [1, 128], strides = [1, 1]} : vector<9x128xf32> to vector<1x128xf32>
    %44 = vector.broadcast %43 : vector<1x128xf32> to vector<8x128xf32>
    %45 = arith.mulf %42, %44 : vector<8x128xf32>
    %c40 = arith.constant 40 : index
    %c0_23 = arith.constant 0 : index
    %46 = vector.load %arg12[%c40, %c0_23] : memref<72x128xf32, #tpu.memory_space<vmem>>, vector<8x128xf32>
    tpu.vector_store %arg12[%c40, %c0_23], %45 {strides = array<i32>} : memref<72x128xf32, #tpu.memory_space<vmem>>, vector<8x128xf32>,
    %c121_i32 = arith.constant 121 : i32
    %47 = tpu.dynamic_rotate %19 by %c121_i32 dim 1 : vector<8x128xf32>, i32 -> vector<8x128xf32>
    %48 = vector.extract_strided_slice %20 {offsets = [6, 0], sizes = [1, 128], strides = [1, 1]} : vector<9x128xf32> to vector<1x128xf32>
    %49 = vector.broadcast %48 : vector<1x128xf32> to vector<8x128xf32>
    %50 = arith.mulf %47, %49 : vector<8x128xf32>
    %c48 = arith.constant 48 : index
    %c0_24 = arith.constant 0 : index
    %51 = vector.load %arg12[%c48, %c0_24] : memref<72x128xf32, #tpu.memory_space<vmem>>, vector<8x128xf32>
    tpu.vector_store %arg12[%c48, %c0_24], %50 {strides = array<i32>} : memref<72x128xf32, #tpu.memory_space<vmem>>, vector<8x128xf32>,
    %c120_i32 = arith.constant 120 : i32
    %52 = tpu.dynamic_rotate %19 by %c120_i32 dim 1 : vector<8x128xf32>, i32 -> vector<8x128xf32>
    %53 = vector.extract_strided_slice %20 {offsets = [7, 0], sizes = [1, 128], strides = [1, 1]} : vector<9x128xf32> to vector<1x128xf32>
    %54 = vector.broadcast %53 : vector<1x128xf32> to vector<8x128xf32>
    %55 = arith.mulf %52, %54 : vector<8x128xf32>
    %c56 = arith.constant 56 : index
    %c0_25 = arith.constant 0 : index
    %56 = vector.load %arg12[%c56, %c0_25] : memref<72x128xf32, #tpu.memory_space<vmem>>, vector<8x128xf32>
    tpu.vector_store %arg12[%c56, %c0_25], %55 {strides = array<i32>} : memref<72x128xf32, #tpu.memory_space<vmem>>, vector<8x128xf32>,
    %c119_i32 = arith.constant 119 : i32
    %57 = tpu.dynamic_rotate %19 by %c119_i32 dim 1 : vector<8x128xf32>, i32 -> vector<8x128xf32>
    %58 = vector.extract_strided_slice %20 {offsets = [8, 0], sizes = [1, 128], strides = [1, 1]} : vector<9x128xf32> to vector<1x128xf32>
    %59 = vector.broadcast %58 : vector<1x128xf32> to vector<8x128xf32>
    %60 = arith.mulf %57, %59 : vector<8x128xf32>
    %c64 = arith.constant 64 : index
    %c0_26 = arith.constant 0 : index
    %61 = vector.load %arg12[%c64, %c0_26] : memref<72x128xf32, #tpu.memory_space<vmem>>, vector<8x128xf32>
    tpu.vector_store %arg12[%c64, %c0_26], %60 {strides = array<i32>} : memref<72x128xf32, #tpu.memory_space<vmem>>, vector<8x128xf32>,
    %c0_27 = arith.constant 0 : index
    %c0_28 = arith.constant 0 : index
    %62 = vector.load %arg7[%c0_27, %c0_28] : memref<8x72xf32, #tpu.memory_space<vmem>>, vector<8x72xf32>
    %c0_29 = arith.constant 0 : index
    %c0_30 = arith.constant 0 : index
    %63 = vector.load %arg12[%c0_29, %c0_30] : memref<72x128xf32, #tpu.memory_space<vmem>>, vector<72x128xf32>
    %cst_31 = arith.constant dense<0.000000e+00> : vector<8x128xf32>
    %64 = tpu.matmul %62, %63, %cst_31 {dimension_numbers = #tpu.dot_dimension_numbers<[1], [0], [0], [1], [0, 0, 1, 1], [], []>} : vector<8x72xf32>, vector<72x128xf32>, vector<8x128xf32> -> vector<8x128xf32>
    %c0_32 = arith.constant 0 : index
    %c0_33 = arith.constant 0 : index
    %65 = vector.load %arg8[%c0_32, %c0_33] : memref<8x1xf32, #tpu.memory_space<vmem>>, vector<8x1xf32>
    %66 = vector.broadcast %65 : vector<8x1xf32> to vector<8x128xf32>
    %67 = arith.addf %64, %66 : vector<8x128xf32>
    %c0_34 = arith.constant 0 : index
    %c0_35 = arith.constant 0 : index
    %68 = vector.load %arg5[%c0_34, %c0_35] : memref<128x2xf32, #tpu.memory_space<vmem>>, vector<128x2xf32>
    %cst_36 = arith.constant dense<0.000000e+00> : vector<8x2xf32>
    %69 = tpu.matmul %67, %68, %cst_36 {dimension_numbers = #tpu.dot_dimension_numbers<[1], [0], [0], [1], [0, 0, 1, 1], [], []>} : vector<8x128xf32>, vector<128x2xf32>, vector<8x2xf32> -> vector<8x2xf32>
    %70 = arith.mulf %67, %67 : vector<8x128xf32>
    %c0_37 = arith.constant 0 : index
    %c0_38 = arith.constant 0 : index
    %71 = vector.load %arg5[%c0_37, %c0_38] : memref<128x2xf32, #tpu.memory_space<vmem>>, vector<128x2xf32>
    %cst_39 = arith.constant dense<0.000000e+00> : vector<8x2xf32>
    %72 = tpu.matmul %70, %71, %cst_39 {dimension_numbers = #tpu.dot_dimension_numbers<[1], [0], [0], [1], [0, 0, 1, 1], [], []>} : vector<8x128xf32>, vector<128x2xf32>, vector<8x2xf32> -> vector<8x2xf32>
    %cst_40 = arith.constant 1.562500e-02 : f32
    %73 = vector.broadcast %cst_40 : f32 to vector<8x2xf32>
    %74 = arith.mulf %69, %73 : vector<8x2xf32>
    %cst_41 = arith.constant 1.562500e-02 : f32
    %75 = vector.broadcast %cst_41 : f32 to vector<8x2xf32>
    %76 = arith.mulf %72, %75 : vector<8x2xf32>
    %77 = arith.mulf %74, %74 : vector<8x2xf32>
    %78 = arith.subf %76, %77 : vector<8x2xf32>
    %cst_42 = arith.constant 9.99999974E-6 : f32
    %79 = vector.broadcast %cst_42 : f32 to vector<8x2xf32>
    %80 = arith.addf %78, %79 : vector<8x2xf32>
    %81 = math.rsqrt %80 : vector<8x2xf32>
    %c0_43 = arith.constant 0 : index
    %c0_44 = arith.constant 0 : index
    %82 = vector.load %arg6[%c0_43, %c0_44] : memref<2x128xf32, #tpu.memory_space<vmem>>, vector<2x128xf32>
    %cst_45 = arith.constant dense<0.000000e+00> : vector<8x128xf32>
    %83 = tpu.matmul %74, %82, %cst_45 {dimension_numbers = #tpu.dot_dimension_numbers<[1], [0], [0], [1], [0, 0, 1, 1], [], []>} : vector<8x2xf32>, vector<2x128xf32>, vector<8x128xf32> -> vector<8x128xf32>
    %c0_46 = arith.constant 0 : index
    %c0_47 = arith.constant 0 : index
    %84 = vector.load %arg6[%c0_46, %c0_47] : memref<2x128xf32, #tpu.memory_space<vmem>>, vector<2x128xf32>
    %cst_48 = arith.constant dense<0.000000e+00> : vector<8x128xf32>
    %85 = tpu.matmul %81, %84, %cst_48 {dimension_numbers = #tpu.dot_dimension_numbers<[1], [0], [0], [1], [0, 0, 1, 1], [], []>} : vector<8x2xf32>, vector<2x128xf32>, vector<8x128xf32> -> vector<8x128xf32>
    %86 = arith.subf %67, %83 : vector<8x128xf32>
    %87 = arith.mulf %86, %85 : vector<8x128xf32>
    %cst_49 = arith.constant 0.000000e+00 : f32
    %88 = vector.broadcast %cst_49 : f32 to vector<8x128xf32>
    %89 = arith.cmpf oge, %87, %88 : vector<8x128xf32>
    %cst_50 = arith.constant 2.000000e-01 : f32
    %90 = vector.broadcast %cst_50 : f32 to vector<8x128xf32>
    %91 = arith.mulf %90, %87 : vector<8x128xf32>
    %92 = arith.select %89, %87, %91 : vector<8x128xi1>, vector<8x128xf32>
    %c9_i32_51 = arith.constant 9 : i32
    %93 = tpu.dynamic_rotate %92 by %c9_i32_51 dim 1 : vector<8x128xf32>, i32 -> vector<8x128xf32>
    %94 = vector.extract_strided_slice %20 {offsets = [0, 0], sizes = [1, 128], strides = [1, 1]} : vector<9x128xf32> to vector<1x128xf32>
    %95 = vector.broadcast %94 : vector<1x128xf32> to vector<8x128xf32>
    %96 = arith.mulf %93, %95 : vector<8x128xf32>
    %c0_52 = arith.constant 0 : index
    %c0_53 = arith.constant 0 : index
    %97 = vector.load %arg13[%c0_52, %c0_53] : memref<72x128xf32, #tpu.memory_space<vmem>>, vector<8x128xf32>
    tpu.vector_store %arg13[%c0_52, %c0_53], %96 {strides = array<i32>} : memref<72x128xf32, #tpu.memory_space<vmem>>, vector<8x128xf32>,
    %c8_i32_54 = arith.constant 8 : i32
    %98 = tpu.dynamic_rotate %92 by %c8_i32_54 dim 1 : vector<8x128xf32>, i32 -> vector<8x128xf32>
    %99 = vector.extract_strided_slice %20 {offsets = [1, 0], sizes = [1, 128], strides = [1, 1]} : vector<9x128xf32> to vector<1x128xf32>
    %100 = vector.broadcast %99 : vector<1x128xf32> to vector<8x128xf32>
    %101 = arith.mulf %98, %100 : vector<8x128xf32>
    %c8_55 = arith.constant 8 : index
    %c0_56 = arith.constant 0 : index
    %102 = vector.load %arg13[%c8_55, %c0_56] : memref<72x128xf32, #tpu.memory_space<vmem>>, vector<8x128xf32>
    tpu.vector_store %arg13[%c8_55, %c0_56], %101 {strides = array<i32>} : memref<72x128xf32, #tpu.memory_space<vmem>>, vector<8x128xf32>,
    %c7_i32_57 = arith.constant 7 : i32
    %103 = tpu.dynamic_rotate %92 by %c7_i32_57 dim 1 : vector<8x128xf32>, i32 -> vector<8x128xf32>
    %104 = vector.extract_strided_slice %20 {offsets = [2, 0], sizes = [1, 128], strides = [1, 1]} : vector<9x128xf32> to vector<1x128xf32>
    %105 = vector.broadcast %104 : vector<1x128xf32> to vector<8x128xf32>
    %106 = arith.mulf %103, %105 : vector<8x128xf32>
    %c16_58 = arith.constant 16 : index
    %c0_59 = arith.constant 0 : index
    %107 = vector.load %arg13[%c16_58, %c0_59] : memref<72x128xf32, #tpu.memory_space<vmem>>, vector<8x128xf32>
    tpu.vector_store %arg13[%c16_58, %c0_59], %106 {strides = array<i32>} : memref<72x128xf32, #tpu.memory_space<vmem>>, vector<8x128xf32>,
    %c1_i32_60 = arith.constant 1 : i32
    %108 = tpu.dynamic_rotate %92 by %c1_i32_60 dim 1 : vector<8x128xf32>, i32 -> vector<8x128xf32>
    %109 = vector.extract_strided_slice %20 {offsets = [3, 0], sizes = [1, 128], strides = [1, 1]} : vector<9x128xf32> to vector<1x128xf32>
    %110 = vector.broadcast %109 : vector<1x128xf32> to vector<8x128xf32>
    %111 = arith.mulf %108, %110 : vector<8x128xf32>
    %c24_61 = arith.constant 24 : index
    %c0_62 = arith.constant 0 : index
    %112 = vector.load %arg13[%c24_61, %c0_62] : memref<72x128xf32, #tpu.memory_space<vmem>>, vector<8x128xf32>
    tpu.vector_store %arg13[%c24_61, %c0_62], %111 {strides = array<i32>} : memref<72x128xf32, #tpu.memory_space<vmem>>, vector<8x128xf32>,
    %c32_63 = arith.constant 32 : index
    %c0_64 = arith.constant 0 : index
    %113 = vector.load %arg13[%c32_63, %c0_64] : memref<72x128xf32, #tpu.memory_space<vmem>>, vector<8x128xf32>
    tpu.vector_store %arg13[%c32_63, %c0_64], %92 {strides = array<i32>} : memref<72x128xf32, #tpu.memory_space<vmem>>, vector<8x128xf32>,
    %c127_i32_65 = arith.constant 127 : i32
    %114 = tpu.dynamic_rotate %92 by %c127_i32_65 dim 1 : vector<8x128xf32>, i32 -> vector<8x128xf32>
    %115 = vector.extract_strided_slice %20 {offsets = [5, 0], sizes = [1, 128], strides = [1, 1]} : vector<9x128xf32> to vector<1x128xf32>
    %116 = vector.broadcast %115 : vector<1x128xf32> to vector<8x128xf32>
    %117 = arith.mulf %114, %116 : vector<8x128xf32>
    %c40_66 = arith.constant 40 : index
    %c0_67 = arith.constant 0 : index
    %118 = vector.load %arg13[%c40_66, %c0_67] : memref<72x128xf32, #tpu.memory_space<vmem>>, vector<8x128xf32>
    tpu.vector_store %arg13[%c40_66, %c0_67], %117 {strides = array<i32>} : memref<72x128xf32, #tpu.memory_space<vmem>>, vector<8x128xf32>,
    %c121_i32_68 = arith.constant 121 : i32
    %119 = tpu.dynamic_rotate %92 by %c121_i32_68 dim 1 : vector<8x128xf32>, i32 -> vector<8x128xf32>
    %120 = vector.extract_strided_slice %20 {offsets = [6, 0], sizes = [1, 128], strides = [1, 1]} : vector<9x128xf32> to vector<1x128xf32>
    %121 = vector.broadcast %120 : vector<1x128xf32> to vector<8x128xf32>
    %122 = arith.mulf %119, %121 : vector<8x128xf32>
    %c48_69 = arith.constant 48 : index
    %c0_70 = arith.constant 0 : index
    %123 = vector.load %arg13[%c48_69, %c0_70] : memref<72x128xf32, #tpu.memory_space<vmem>>, vector<8x128xf32>
    tpu.vector_store %arg13[%c48_69, %c0_70], %122 {strides = array<i32>} : memref<72x128xf32, #tpu.memory_space<vmem>>, vector<8x128xf32>,
    %c120_i32_71 = arith.constant 120 : i32
    %124 = tpu.dynamic_rotate %92 by %c120_i32_71 dim 1 : vector<8x128xf32>, i32 -> vector<8x128xf32>
    %125 = vector.extract_strided_slice %20 {offsets = [7, 0], sizes = [1, 128], strides = [1, 1]} : vector<9x128xf32> to vector<1x128xf32>
    %126 = vector.broadcast %125 : vector<1x128xf32> to vector<8x128xf32>
    %127 = arith.mulf %124, %126 : vector<8x128xf32>
    %c56_72 = arith.constant 56 : index
    %c0_73 = arith.constant 0 : index
    %128 = vector.load %arg13[%c56_72, %c0_73] : memref<72x128xf32, #tpu.memory_space<vmem>>, vector<8x128xf32>
    tpu.vector_store %arg13[%c56_72, %c0_73], %127 {strides = array<i32>} : memref<72x128xf32, #tpu.memory_space<vmem>>, vector<8x128xf32>,
    %c119_i32_74 = arith.constant 119 : i32
    %129 = tpu.dynamic_rotate %92 by %c119_i32_74 dim 1 : vector<8x128xf32>, i32 -> vector<8x128xf32>
    %130 = vector.extract_strided_slice %20 {offsets = [8, 0], sizes = [1, 128], strides = [1, 1]} : vector<9x128xf32> to vector<1x128xf32>
    %131 = vector.broadcast %130 : vector<1x128xf32> to vector<8x128xf32>
    %132 = arith.mulf %129, %131 : vector<8x128xf32>
    %c64_75 = arith.constant 64 : index
    %c0_76 = arith.constant 0 : index
    %133 = vector.load %arg13[%c64_75, %c0_76] : memref<72x128xf32, #tpu.memory_space<vmem>>, vector<8x128xf32>
    tpu.vector_store %arg13[%c64_75, %c0_76], %132 {strides = array<i32>} : memref<72x128xf32, #tpu.memory_space<vmem>>, vector<8x128xf32>,
    %c0_77 = arith.constant 0 : index
    %c0_78 = arith.constant 0 : index
    %134 = vector.load %arg9[%c0_77, %c0_78] : memref<8x72xf32, #tpu.memory_space<vmem>>, vector<8x72xf32>
    %c0_79 = arith.constant 0 : index
    %c0_80 = arith.constant 0 : index
    %135 = vector.load %arg13[%c0_79, %c0_80] : memref<72x128xf32, #tpu.memory_space<vmem>>, vector<72x128xf32>
    %cst_81 = arith.constant dense<0.000000e+00> : vector<8x128xf32>
    %136 = tpu.matmul %134, %135, %cst_81 {dimension_numbers = #tpu.dot_dimension_numbers<[1], [0], [0], [1], [0, 0, 1, 1], [], []>} : vector<8x72xf32>, vector<72x128xf32>, vector<8x128xf32> -> vector<8x128xf32>
    %c0_82 = arith.constant 0 : index
    %c0_83 = arith.constant 0 : index
    %137 = vector.load %arg10[%c0_82, %c0_83] : memref<8x1xf32, #tpu.memory_space<vmem>>, vector<8x1xf32>
    %138 = vector.broadcast %137 : vector<8x1xf32> to vector<8x128xf32>
    %139 = arith.addf %136, %138 : vector<8x128xf32>
    %c0_84 = arith.constant 0 : index
    %c0_85 = arith.constant 0 : index
    %140 = vector.load %arg5[%c0_84, %c0_85] : memref<128x2xf32, #tpu.memory_space<vmem>>, vector<128x2xf32>
    %cst_86 = arith.constant dense<0.000000e+00> : vector<8x2xf32>
    %141 = tpu.matmul %139, %140, %cst_86 {dimension_numbers = #tpu.dot_dimension_numbers<[1], [0], [0], [1], [0, 0, 1, 1], [], []>} : vector<8x128xf32>, vector<128x2xf32>, vector<8x2xf32> -> vector<8x2xf32>
    %142 = arith.mulf %139, %139 : vector<8x128xf32>
    %c0_87 = arith.constant 0 : index
    %c0_88 = arith.constant 0 : index
    %143 = vector.load %arg5[%c0_87, %c0_88] : memref<128x2xf32, #tpu.memory_space<vmem>>, vector<128x2xf32>
    %cst_89 = arith.constant dense<0.000000e+00> : vector<8x2xf32>
    %144 = tpu.matmul %142, %143, %cst_89 {dimension_numbers = #tpu.dot_dimension_numbers<[1], [0], [0], [1], [0, 0, 1, 1], [], []>} : vector<8x128xf32>, vector<128x2xf32>, vector<8x2xf32> -> vector<8x2xf32>
    %cst_90 = arith.constant 1.562500e-02 : f32
    %145 = vector.broadcast %cst_90 : f32 to vector<8x2xf32>
    %146 = arith.mulf %141, %145 : vector<8x2xf32>
    %cst_91 = arith.constant 1.562500e-02 : f32
    %147 = vector.broadcast %cst_91 : f32 to vector<8x2xf32>
    %148 = arith.mulf %144, %147 : vector<8x2xf32>
    %149 = arith.mulf %146, %146 : vector<8x2xf32>
    %150 = arith.subf %148, %149 : vector<8x2xf32>
    %cst_92 = arith.constant 9.99999974E-6 : f32
    %151 = vector.broadcast %cst_92 : f32 to vector<8x2xf32>
    %152 = arith.addf %150, %151 : vector<8x2xf32>
    %153 = math.rsqrt %152 : vector<8x2xf32>
    %c0_93 = arith.constant 0 : index
    %c0_94 = arith.constant 0 : index
    %154 = vector.load %arg6[%c0_93, %c0_94] : memref<2x128xf32, #tpu.memory_space<vmem>>, vector<2x128xf32>
    %cst_95 = arith.constant dense<0.000000e+00> : vector<8x128xf32>
    %155 = tpu.matmul %146, %154, %cst_95 {dimension_numbers = #tpu.dot_dimension_numbers<[1], [0], [0], [1], [0, 0, 1, 1], [], []>} : vector<8x2xf32>, vector<2x128xf32>, vector<8x128xf32> -> vector<8x128xf32>
    %c0_96 = arith.constant 0 : index
    %c0_97 = arith.constant 0 : index
    %156 = vector.load %arg6[%c0_96, %c0_97] : memref<2x128xf32, #tpu.memory_space<vmem>>, vector<2x128xf32>
    %cst_98 = arith.constant dense<0.000000e+00> : vector<8x128xf32>
    %157 = tpu.matmul %153, %156, %cst_98 {dimension_numbers = #tpu.dot_dimension_numbers<[1], [0], [0], [1], [0, 0, 1, 1], [], []>} : vector<8x2xf32>, vector<2x128xf32>, vector<8x128xf32> -> vector<8x128xf32>
    %158 = arith.subf %139, %155 : vector<8x128xf32>
    %159 = arith.mulf %158, %157 : vector<8x128xf32>
    %cst_99 = arith.constant 0.000000e+00 : f32
    %160 = vector.broadcast %cst_99 : f32 to vector<8x128xf32>
    %161 = arith.cmpf oge, %159, %160 : vector<8x128xf32>
    %cst_100 = arith.constant 2.000000e-01 : f32
    %162 = vector.broadcast %cst_100 : f32 to vector<8x128xf32>
    %163 = arith.mulf %162, %159 : vector<8x128xf32>
    %164 = arith.select %161, %159, %163 : vector<8x128xi1>, vector<8x128xf32>
    %c0_101 = arith.constant 0 : index
    %c0_102 = arith.constant 0 : index
    %165 = vector.load %arg11[%c0_101, %c0_102] : memref<8x128xf32, #tpu.memory_space<vmem>>, vector<8x128xf32>
    tpu.vector_store %arg11[%c0_101, %c0_102], %164 {strides = array<i32>} : memref<8x128xf32, #tpu.memory_space<vmem>>, vector<8x128xf32>,
    return
  }
  func.func @transform_0(%arg0: i32) -> (i32, i32) {
    %c0_i32 = arith.constant 0 : i32
    %c0_i32_0 = arith.constant 0 : i32
    return %arg0, %c0_i32 : i32, i32
  }
  func.func @transform_1(%arg0: i32) -> (i32, i32, i32) {
    %c0_i32 = arith.constant 0 : i32
    %c0_i32_0 = arith.constant 0 : i32
    %c0_i32_1 = arith.constant 0 : i32
    %c0_i32_2 = arith.constant 0 : i32
    return %c0_i32, %c0_i32_0, %c0_i32_1 : i32, i32, i32
  }
  func.func @transform_2(%arg0: i32) -> (i32, i32, i32) {
    %c0_i32 = arith.constant 0 : i32
    %c0_i32_0 = arith.constant 0 : i32
    %c0_i32_1 = arith.constant 0 : i32
    %c0_i32_2 = arith.constant 0 : i32
    return %c0_i32, %c0_i32_0, %c0_i32_1 : i32, i32, i32
  }
  func.func @transform_3(%arg0: i32) -> (i32, i32) {
    %c0_i32 = arith.constant 0 : i32
    %c0_i32_0 = arith.constant 0 : i32
    %c0_i32_1 = arith.constant 0 : i32
    return %c0_i32, %c0_i32_0 : i32, i32
  }
  func.func @transform_4(%arg0: i32) -> (i32, i32) {
    %c0_i32 = arith.constant 0 : i32
    %c0_i32_0 = arith.constant 0 : i32
    %c0_i32_1 = arith.constant 0 : i32
    return %c0_i32, %c0_i32_0 : i32, i32
  }
  func.func @transform_5(%arg0: i32) -> (i32, i32) {
    %c0_i32 = arith.constant 0 : i32
    %c0_i32_0 = arith.constant 0 : i32
    %c0_i32_1 = arith.constant 0 : i32
    return %c0_i32, %c0_i32_0 : i32, i32
  }
  func.func @transform_6(%arg0: i32) -> (i32, i32) {
    %c0_i32 = arith.constant 0 : i32
    %c0_i32_0 = arith.constant 0 : i32
    %c0_i32_1 = arith.constant 0 : i32
    return %c0_i32, %c0_i32_0 : i32, i32
  }
  func.func @transform_7(%arg0: i32) -> (i32, i32) {
    %c0_i32 = arith.constant 0 : i32
    %c0_i32_0 = arith.constant 0 : i32
    %c0_i32_1 = arith.constant 0 : i32
    return %c0_i32, %c0_i32_0 : i32, i32
  }
  func.func @transform_8(%arg0: i32) -> (i32, i32) {
    %c0_i32 = arith.constant 0 : i32
    %c0_i32_0 = arith.constant 0 : i32
    %c0_i32_1 = arith.constant 0 : i32
    return %c0_i32, %c0_i32_0 : i32, i32
  }
  func.func @transform_9(%arg0: i32) -> (i32, i32) {
    %c0_i32 = arith.constant 0 : i32
    %c0_i32_0 = arith.constant 0 : i32
    %c0_i32_1 = arith.constant 0 : i32
    return %c0_i32, %c0_i32_0 : i32, i32
  }
  func.func @transform_10(%arg0: i32) -> (i32, i32) {
    %c0_i32 = arith.constant 0 : i32
    %c0_i32_0 = arith.constant 0 : i32
    return %c0_i32, %arg0 : i32, i32
  }
}

</mosaic_0001>

<bundles_post_ra>
// kernel: tpu_custom_call.1
= control target key start
LH: loop header
LB: loop body
LE: loop exit
PB: predicated region body
PF: predicated region fallthrough
CT: control target
= control target key end

     0   :  { %15 = vsyncpa [#allocation5], 0  ;;  %s2866_s0 = inlined_call_operand.vmem [shape: f32[16,256], index: 0, kind: input, shape index: {}]   ;;  %s2867_s1 = inlined_call_operand.vmem [shape: f32[2,8,8], index: 1, kind: input, shape index: {}]   ;;  %s2868_s2 = inlined_call_operand.hbm [shape: f32[2,256,128], index: 2, kind: input, shape index: {}]   ;;  %s2869_s3 = inlined_call_operand.vmem [shape: f32[9,128], index: 3, kind: input, shape index: {}]   ;;  %s2870_s4 = inlined_call_operand.vmem [shape: f32[128,2], index: 4, kind: input, shape index: {}]   ;;  %s2871_s5 = inlined_call_operand.vmem [shape: f32[2,128], index: 5, kind: input, shape index: {}]   ;;  %s2872_s6 = inlined_call_operand.vmem [shape: f32[8,72], index: 6, kind: input, shape index: {}]   ;;  %s2873_s7 = inlined_call_operand.vmem [shape: f32[8,1], index: 7, kind: input, shape index: {}]   ;;  %s2874_s8 = inlined_call_operand.vmem [shape: f32[8,72], index: 8, kind: input, shape index: {}]   ;;  %s2875_s9 = inlined_call_operand.vmem [shape: f32[8,1], index: 9, kind: input, shape index: {}]   ;;  %s2876_s10 = inlined_call_operand.hbm [shape: f32[8,256], index: 10, kind: output, shape index: {}]  }
   0x1   :  { %16 = vsyncpa [#allocation6], 0 }
   0x2   :  { %18 = vsyncpa [#allocation6 + $0x1], 0  ;;  %s2394_s13 = smov 0   ;;  %s2396_s14 = smov 0  }
   0x3   :  { %s2398_s15 = smov 0   ;;  %s2400_s16 = smov 0  }
   0x4 LB: > { %s2415_s17 = sadd.s32 4294967295, %s2320_s16   ;;  %s1764_s18 = sadd.s32 4294967294, %s2320_s16   ;;  %s2320_s16 = sphi %s2400_s16, %s2890_s16   ;;  %s2316_s15 = sphi %s2398_s15, %s2889_s15   ;;  %s2312_s14 = sphi %s2396_s14, %s2888_s14   ;;  %s2308_s13 = sphi %s2394_s13, %s2887_s13  }
   0x5   : > { %s2419_s19 = sadd.s32 1, %s2320_s16   ;;  %s246_s20 = sadd.s32 1, %s2316_s15 }
   0x6   : > { %s243_s21 = ssub.s32 %s2320_s16, %s2419_s19  ;;  %p256_p0 = scmp.ne.s32.totalorder %s2316_s15, %s2312_s14 }
   0x7   : > { %p244_p1 = scmp.eq.s32.totalorder %s243_s21, 0  ;;  %p257_p2 = scmp.eq.s32.totalorder %s2415_s17, 1 }
   0x8   : > { %p262_p3 = scmp.ne.s32.totalorder %s2312_s14, %s2308_s13  ;;  %p263_p4 = scmp.eq.s32.totalorder %s1764_s18, 1 }
   0x9   : > { %s2430_s22 = scalar_select %p244_p1, %s2316_s15, %s246_s20  }
   0xa   : > { %p2432_p5 = por %p257_p2, %p256_p0  ;;  %p2436_p6 = por %p263_p4, %p262_p3 }
   0xb   : > { %p1765_p7 = scmp.ge.s32.totalorder %s2320_s16, 1  ;;  %p270_p8 = scmp.lt.s32.totalorder %s2320_s16, 3 }
   0xc   : > { %s2881_s24 = scalar_select %p2436_p6, 1, 0 }
   0xd   : > { %p2174_p9 = scmp.eq.s32.totalorder %s2415_s17, 0  ;;  %p2443_p10 = pnand %p1765_p7, %p270_p8 }
   0xe   : > { %s2322_s26 = smov [#allocation4]  }
   0xf   : > { %s285_s27 = sshll.u32 %s2322_s26, 4  ;;  %p2166_p11 = pneg %p2443_p10  ;;  %s286_s27 = int_to_ptr.vmem [resolvable:$true] %s285_s27 }
  0x10   : > { %s2241_s28 = scalar_lea.vmem %s286_s27, 8192  ;;  %p2249_p3 = scmp.lt.s32.totalorder %s286_s27, %s286_s27 }
  0x11   : > { %p2167_p12 = pnand %p2174_p9, %p2166_p11  ;;  %p2242_p0 = scmp.ne.s32.totalorder %s286_s27, %s2241_s28 }
  0x12   : > { %p2250_p4 = scmp.lt.s32.totalorder %s2241_s28, %s2241_s28 }
  0x13   : > { %p2232_p13 = pneg %p2167_p12 }
  0x14   : > { %p2251_p6 = por %p2250_p4, %p2249_p3 }
  0x15   : > { %p2244_p1 = pnand %p2242_p0, %p2232_p13 }
  0x17   : > { %p2245_p2 = pneg %p2244_p1 }
  0x19   : > { %p2252_p7 = pnand %p2251_p6, %p2245_p2 }
  0x1b   : > { %2255 = shalt.err (!%p2252_p7)
}
  0x1c   : > { %s2323_s29 = smov 128   ;;  %s2324_s30 = smov 8  }
  0x1d   : > { %2169 = dma.hbm_to_vmem [thread:$0]  (!%p2167_p12), %s2868_s2, 8192, %s286_s27, [#allocation5], %s2323_s29, %s2323_s29, %s2324_s30  }
  0x1e   : > { %330 = sbr.rel (%p2443_p10) target bundleno = 2065 (0x811), region = 60 }
  0x23   : > { %2299 = dma.done.wait (%p2174_p9), [#allocation5], 8192  }
  0x24   : > { %2301 = vsyncadd (%p2174_p9), [#allocation5], 4294959104  ;;  %p368_p8 = scmp.lt.s32.totalorder %s2415_s17, 1  ;;  %v2325_v1 = vmov 0.0   ;;  %s2326_s25 = smov 112   ;;  %v379_v3 = vlaneseq  ;;  %v404_v23 = vld [vmem:[%s2867_s1] sm:$0xff] }
  0x25   : > { %473 = vmatprep.mubr.f32.mxu0 %v2325_v1  ;;  %581 = vmatprep.mubr.f32.mxu1 %v2325_v1  ;;  %s2878_s27 = smov 127   ;;  %s2328_s29 = smov 111   ;;  %vm405_vm3 = vcmask 64512   ;;  %v1774_v24 = vld [vmem:[%s2867_s1 + $0x8] sm:$0xff]  ;;  %v620_v25 = vld [vmem:[#allocation4 + $0x1f8] sm:$0xff]  ;;  %v619_v29 = vld [vmem:[#allocation4 + $0x1f0] sm:$0xff] }
  0x26   : > { %s369_s18 = scalar_select %p368_p8, %s2415_s17, 1  ;;  %v380_v4 = vand.u32 127, %v379_v3  ;;  %v511_v26 = vld [vmem:[#allocation4 + $0xf8] sm:$0xff]  ;;  %v510_v30 = vld [vmem:[#allocation4 + $0xf0] sm:$0xff]  ;;  %v618_v33 = vld [vmem:[#allocation4 + $0x1e8] sm:$0xff]  ;;  %vm2332_vm4 = vmmov 0  }
  0x27   : > { %v604_v27 = vld [vmem:[#allocation4 + $0x178] sm:$0xff]  ;;  %v603_v31 = vld [vmem:[#allocation4 + $0x170] sm:$0xff]  ;;  %v509_v34 = vld [vmem:[#allocation4 + $0xe8] sm:$0xff]  ;;  %s2330_s21 = smov 119   ;;  %s2331_s26 = smov 121   ;;  %vm844_vm5 = vcmask 588800  }
  0x28   : > { %s1791_s20 = sshll.u32 %s369_s18, 4  ;;  %vm381_vm0 = vcmp.lt.s32.totalorder %v380_v4, 127  ;;  %vm390_vm1 = vcmp.lt.s32.totalorder %v380_v4, 112  ;;  %vm399_vm2 = vcmp.lt.s32.totalorder %v380_v4, 111  ;;  %v495_v28 = vld [vmem:[#allocation4 + $0x78] sm:$0xff]  ;;  %v494_v32 = vld [vmem:[#allocation4 + $0x70] sm:$0xff] }
  0x29   : > { %s372_s28 = scalar_lea.vmem %s2866_s0, %s1791_s20  ;;  %v602_v35 = vld [vmem:[#allocation4 + $0x168] sm:$0xff]  ;;  %v617_v37 = vld [vmem:[#allocation4 + $0x1e0] sm:$0xff]  ;;  %v616_v41 = vld [vmem:[#allocation4 + $0x1d8] sm:$0xff]  ;;  %s2879_s20 = smov 120   ;;  %vm1086_vm6 = vcmask 1041408   ;;  %vm1082_vm7 = vcmask 15360  }
  0x2a   : > { %v373_v0 = vld [vmem:[%s372_s28] sm:$0xff]  ;;  %v374_v2 = vld [vmem:[%s372_s28 + $0x8] sm:$0xff]  ;;  %v507_v42 = vld [vmem:[#allocation4 + $0xd8] sm:$0xff]  ;;  %s2877_s11 = smov 7   ;;  %s2335_s12 = smov 1  }
  0x2b   : > { %386 = vrot.lane.b32.xlu1 %v373_v0, %s2326_s25  ;;  %375 = vrot.lane.b32.xlu0 %v373_v0, %s2878_s27  ;;  %v493_v36 = vld [vmem:[#allocation4 + $0x68] sm:$0xff]  ;;  %v508_v38 = vld [vmem:[#allocation4 + $0xe0] sm:$0xff]  ;;  %v600_v43 = vld [vmem:[#allocation4 + $0x158] sm:$0xff]  ;;  %s2884_s30 = smov 127   ;;  %s2885_s18 = smov 7  }
  0x2c   : > { %v601_v39 = vld [vmem:[#allocation4 + $0x160] sm:$0xff]  ;;  %v491_v44 = vld [vmem:[#allocation4 + $0x58] sm:$0xff]  ;;  %v615_v45 = vld [vmem:[#allocation4 + $0x1d0] sm:$0xff] }
  0x2d   : > { %v492_v40 = vld [vmem:[#allocation4 + $0x60] sm:$0xff]  ;;  %v506_v46 = vld [vmem:[#allocation4 + $0xd0] sm:$0xff]  ;;  %v614_v49 = vld [vmem:[#allocation4 + $0x1c8] sm:$0xff] }
  0x2e   : > { %v599_v47 = vld [vmem:[#allocation4 + $0x150] sm:$0xff]  ;;  %v505_v50 = vld [vmem:[#allocation4 + $0xc8] sm:$0xff]  ;;  %v613_v53 = vld [vmem:[#allocation4 + $0x1c0] sm:$0xff] }
  0x2f   : > { %388 = vrot.lane.b32.xlu1 %v374_v2, %s2326_s25  ;;  %377 = vrot.lane.b32.xlu0 %v374_v2, %s2878_s27  ;;  %v490_v48 = vld [vmem:[#allocation4 + $0x50] sm:$0xff]  ;;  %v598_v51 = vld [vmem:[#allocation4 + $0x148] sm:$0xff]  ;;  %v504_v54 = vld [vmem:[#allocation4 + $0xc0] sm:$0xff]  ;;  %s2336_s25 = smov 9  }
  0x30   : > { %v489_v52 = vld [vmem:[#allocation4 + $0x48] sm:$0xff]  ;;  %v597_v55 = vld [vmem:[#allocation4 + $0x140] sm:$0xff]  ;;  %v612_v57 = vld [vmem:[#allocation4 + $0x1b8] sm:$0xff] }
  0x31   : > { %v488_v56 = vld [vmem:[#allocation4 + $0x40] sm:$0xff]  ;;  %v503_v58 = vld [vmem:[#allocation4 + $0xb8] sm:$0xff]  ;;  %v611_v61 = vld [vmem:[#allocation4 + $0x1b0] sm:$0xff] }
  0x32   : > { %v596_v59 = vld [vmem:[#allocation4 + $0x138] sm:$0xff]  ;;  %v502_v62 = vld [vmem:[#allocation4 + $0xb0] sm:$0xff]  ;;  %v501_v4 = vld [vmem:[#allocation4 + $0xa8] sm:$0xff] }
  0x33   : > { %397 = vrot.lane.b32.xlu1 %v374_v2, %s2328_s29  ;;  %395 = vrot.lane.b32.xlu0 %v373_v0, %s2328_s29  ;;  %v487_v60 = vld [vmem:[#allocation4 + $0x38] sm:$0xff]  ;;  %v595_v63 = vld [vmem:[#allocation4 + $0x130] sm:$0xff]  ;;  %s2337_s29 = smov 8  }
  0x9d   : > { %v387_v5 = vpop.permute.xlu1 %386  ;;  %v376_v6 = vpop.permute.xlu0 %375 }
  0xa1   : > { %v389_v7 = vpop.permute.xlu1 %388  ;;  %v378_v8 = vpop.permute.xlu0 %377 }
  0xa2   : > { %v382_v9 = vsel %vm381_vm0, %v376_v6, %v378_v8  ;;  %v383_v10 = vsel %vm381_vm0, %v378_v8, %v376_v6  ;;  %v391_v13 = vsel %vm390_vm1, %v387_v5, %v389_v7  ;;  %v392_v14 = vsel %vm390_vm1, %v389_v7, %v387_v5  ;;  %v594_v5 = vld [vmem:[#allocation4 + $0x128] sm:$0xff]  ;;  %v609_v7 = vld [vmem:[#allocation4 + $0x1a0] sm:$0xff] }
  0xa3   : > { %v384_v11 = vmax.f32 %v373_v0, %v382_v9  ;;  %v385_v12 = vmax.f32 %v374_v2, %v383_v10  ;;  %v486_v0 = vld [vmem:[#allocation4 + $0x30] sm:$0xff]  ;;  %v610_v2 = vld [vmem:[#allocation4 + $0x1a8] sm:$0xff]  ;;  %v500_v8 = vld [vmem:[#allocation4 + $0xa0] sm:$0xff] }
  0xa4   : > { %v485_v6 = vld [vmem:[#allocation4 + $0x28] sm:$0xff]  ;;  %v593_v9 = vld [vmem:[#allocation4 + $0x120] sm:$0xff] }
  0xa5   : > { %v398_v15 = vpop.permute.xlu1 %397  ;;  %v396_v16 = vpop.permute.xlu0 %395  ;;  %v394_v17 = vmax.f32 %v385_v12, %v392_v14  ;;  %v393_v18 = vmax.f32 %v384_v11, %v391_v13  ;;  %v484_v10 = vld [vmem:[#allocation4 + $0x20] sm:$0xff]  ;;  %v608_v11 = vld [vmem:[#allocation4 + $0x198] sm:$0xff] }
  0xa6   : > { %v400_v19 = vsel %vm399_vm2, %v396_v16, %v398_v15  ;;  %v401_v20 = vsel %vm399_vm2, %v398_v15, %v396_v16  ;;  %v499_v12 = vld [vmem:[#allocation4 + $0x98] sm:$0xff]  ;;  %v607_v15 = vld [vmem:[#allocation4 + $0x190] sm:$0xff] }
  0xa7   : > { %v403_v21 = vmax.f32 %v394_v17, %v401_v20  ;;  %v402_v22 = vmax.f32 %v393_v18, %v400_v19  ;;  %v592_v13 = vld [vmem:[#allocation4 + $0x118] sm:$0xff]  ;;  %v498_v16 = vld [vmem:[#allocation4 + $0x90] sm:$0xff]  ;;  %v606_v19 = vld [vmem:[#allocation4 + $0x188] sm:$0xff] }
  0xa8   : > { %v483_v14 = vld [vmem:[#allocation4 + $0x18] sm:$0xff]  ;;  %v591_v17 = vld [vmem:[#allocation4 + $0x110] sm:$0xff]  ;;  %v497_v20 = vld [vmem:[#allocation4 + $0x88] sm:$0xff] }
  0xa9   : > { %439 = vmatprep.subr.mxu0 %v403_v21  ;;  %547 = vmatprep.subr.mxu1 %v403_v21  ;;  %v482_v18 = vld [vmem:[#allocation4 + $0x10] sm:$0xff]  ;;  %v590_v21 = vld [vmem:[#allocation4 + $0x108] sm:$0xff] }
  0xaa   : > { %440 = vmatpush1.msra.mxu0 %v402_v22  ;;  %548 = vmatpush1.msra.mxu1 %v402_v22  ;;  %v481_v22 = vld [vmem:[#allocation4 + $0x8] sm:$0xff] }
  0xab   : > { %1773 = vmatmul.mubr.msk.f32.vlgmr.msra.gmra.mxu0 %vm405_vm3, %v404_v23  ;;  %1775 = vmatmul.mubr.msk.f32.vlgmr.msra.gmra.mxu1 %vm405_vm3, %v1774_v24  ;;  %v605_v23 = vld [vmem:[#allocation4 + $0x180] sm:$0xff] }
  0xac   : > { %1792 = vmatprep.subr.mxu0 %v620_v25  ;;  %1827 = vmatprep.subr.mxu1 %v511_v26  ;;  %v496_v24 = vld [vmem:[#allocation4 + $0x80] sm:$0xff] }
  0xad   : > { %1793 = vmatpush3.msra.mxu0 %v604_v27  ;;  %1828 = vmatpush3.msra.mxu1 %v495_v28  ;;  %v589_v25 = vld [vmem:[#allocation4 + $0x100] sm:$0xff] }
  0xae   : > { %1794 = vmatprep.subr.mxu0 %v619_v29  ;;  %1829 = vmatprep.subr.mxu1 %v510_v30  ;;  %v480_v26 = vld [vmem:[#allocation4] sm:$0xff] }
  0xaf   : > { %1795 = vmatpush3.msra.mxu0 %v603_v31  ;;  %1830 = vmatpush3.msra.mxu1 %v494_v32 }
  0xb0   : > { %1796 = vmatprep.subr.mxu0 %v618_v33  ;;  %1831 = vmatprep.subr.mxu1 %v509_v34 }
  0xb1   : > { %1797 = vmatpush3.msra.mxu0 %v602_v35  ;;  %1832 = vmatpush3.msra.mxu1 %v493_v36 }
  0xb2   : > { %1798 = vmatprep.subr.mxu0 %v617_v37  ;;  %1833 = vmatprep.subr.mxu1 %v508_v38  ;;  %v2495_v38 = vld [vmem:[%s2870_s4 + $0x78] sm:$0xff] }
  0xb3   : > { %1799 = vmatpush3.msra.mxu0 %v601_v39  ;;  %1834 = vmatpush3.msra.mxu1 %v492_v40  ;;  %v2333_v39 = vmov 0   ;;  %v2501_v40 = vld [vmem:[%s2870_s4 + $0x70] sm:$0xff] }
  0xb4   : > { %1800 = vmatprep.subr.mxu0 %v616_v41  ;;  %1835 = vmatprep.subr.mxu1 %v507_v42  ;;  %v2512_v41 = vld [vmem:[%s2870_s4 + $0x68] sm:$0xff]  ;;  %v2522_v42 = vld [vmem:[%s2870_s4 + $0x60] sm:$0xff] }
  0xb5   : > { %1801 = vmatpush3.msra.mxu0 %v600_v43  ;;  %1836 = vmatpush3.msra.mxu1 %v491_v44  ;;  %v838_v43 = vld [vmem:[%s2873_s7] sm:$0xff]  ;;  %v2532_v44 = vld [vmem:[%s2870_s4 + $0x58] sm:$0xff] }
  0xb6   : > { %1802 = vmatprep.subr.mxu0 %v615_v45  ;;  %1837 = vmatprep.subr.mxu1 %v506_v46  ;;  %v2539_v45 = vld [vmem:[%s2870_s4 + $0x50] sm:$0xff]  ;;  %v2546_v46 = vld [vmem:[%s2870_s4 + $0x48] sm:$0xff] }
  0xb7   : > { %1803 = vmatpush3.msra.mxu0 %v599_v47  ;;  %1838 = vmatpush3.msra.mxu1 %v490_v48  ;;  %v2553_v47 = vld [vmem:[%s2870_s4 + $0x40] sm:$0xff]  ;;  %v2560_v48 = vld [vmem:[%s2870_s4 + $0x38] sm:$0xff] }
  0xb8   : > { %1804 = vmatprep.subr.mxu0 %v614_v49  ;;  %1839 = vmatprep.subr.mxu1 %v505_v50  ;;  %v2567_v49 = vld [vmem:[%s2870_s4 + $0x30] sm:$0xff]  ;;  %v2574_v50 = vld [vmem:[%s2870_s4 + $0x28] sm:$0xff] }
  0xb9   : > { %1805 = vmatpush3.msra.mxu0 %v598_v51  ;;  %1840 = vmatpush3.msra.mxu1 %v489_v52  ;;  %v2581_v51 = vld [vmem:[%s2870_s4 + $0x20] sm:$0xff]  ;;  %v2588_v52 = vld [vmem:[%s2870_s4 + $0x18] sm:$0xff] }
  0xba   : > { %1806 = vmatprep.subr.mxu0 %v613_v53  ;;  %1841 = vmatprep.subr.mxu1 %v504_v54  ;;  %v2595_v53 = vld [vmem:[%s2870_s4 + $0x10] sm:$0xff]  ;;  %v766_v54 = vshrl.u32 %v379_v3, 7 }
  0xbb   : > { %1807 = vmatpush3.msra.mxu0 %v597_v55  ;;  %1842 = vmatpush3.msra.mxu1 %v488_v56  ;;  %v761_v56 = vld [vmem:[%s2869_s3] sm:$0xff] }
  0xbc   : > { %1808 = vmatprep.subr.mxu0 %v612_v57  ;;  %1843 = vmatprep.subr.mxu1 %v503_v58  ;;  %v816_v55 = vsub.s32 7, %v766_v54  ;;  %v808_v57 = vsub.s32 6, %v766_v54  ;;  %v2608_v58 = vld [vmem:[%s2869_s3 + $0x8] ss:$0 sm:$0xff] }
  0xbd   : > { %1809 = vmatpush3.msra.mxu0 %v596_v59  ;;  %1844 = vmatpush3.msra.mxu1 %v487_v60  ;;  %v800_v60 = vsub.s32 5, %v766_v54 }
  0xbe   : > { %1810 = vmatprep.subr.mxu0 %v611_v61  ;;  %1845 = vmatprep.subr.mxu1 %v502_v62  ;;  %v2610_v59 = vrot.slane %v761_v56, %v816_v55 }
  0xbf   : > { %1811 = vmatpush3.msra.mxu0 %v595_v63  ;;  %1846 = vmatpush3.msra.mxu1 %v486_v0  ;;  %v2613_v0 = vrot.slane %v761_v56, %v808_v57 }
  0xc0   : > { %1812 = vmatprep.subr.mxu0 %v610_v2  ;;  %1847 = vmatprep.subr.mxu1 %v501_v4  ;;  %v2616_v2 = vrot.slane %v761_v56, %v800_v60  ;;  %v791_v4 = vsub.s32 3, %v766_v54 }
  0xc1   : > { %1813 = vmatpush3.msra.mxu0 %v594_v5  ;;  %1848 = vmatpush3.msra.mxu1 %v485_v6 }
  0xc2   : > { %1814 = vmatprep.subr.mxu0 %v609_v7  ;;  %1849 = vmatprep.subr.mxu1 %v500_v8  ;;  %v783_v8 = vsub.s32 2, %v766_v54 }
  0xc3   : > { %1815 = vmatpush3.msra.mxu0 %v593_v9  ;;  %1850 = vmatpush3.msra.mxu1 %v484_v10  ;;  %v2622_v10 = vrot.slane %v761_v56, %v791_v4 }
  0xc4   : > { %1816 = vmatprep.subr.mxu0 %v608_v11  ;;  %1851 = vmatprep.subr.mxu1 %v499_v12  ;;  %v775_v11 = vsub.s32 1, %v766_v54 }
  0xc5   : > { %1817 = vmatpush3.msra.mxu0 %v592_v13  ;;  %1852 = vmatpush3.msra.mxu1 %v483_v14  ;;  %v2625_v14 = vrot.slane %v761_v56, %v783_v8 }
  0xc6   : > { %1818 = vmatprep.subr.mxu0 %v607_v15  ;;  %1853 = vmatprep.subr.mxu1 %v498_v16  ;;  %v767_v15 = vsub.s32 0, %v766_v54 }
  0xc7   : > { %1819 = vmatpush3.msra.mxu0 %v591_v17  ;;  %1854 = vmatpush3.msra.mxu1 %v482_v18  ;;  %v2630_v17 = vrot.slane %v761_v56, %v775_v11 }
  0xc8   : > { %1820 = vmatprep.subr.mxu0 %v606_v19  ;;  %1855 = vmatprep.subr.mxu1 %v497_v20  ;;  %v2634_v20 = vrot.slane %v761_v56, %v767_v15 }
  0xc9   : > { %1821 = vmatpush3.msra.mxu0 %v590_v21  ;;  %1856 = vmatpush3.msra.mxu1 %v481_v22 }
  0xca   : > { %1822 = vmatprep.subr.mxu0 %v605_v23  ;;  %1857 = vmatprep.subr.mxu1 %v496_v24  ;;  %v828_v24 = vld [vmem:[%s2872_s6] sm:$0xff] }
  0xcb   : > { %1823 = vmatpush3.msra.mxu0 %v589_v25  ;;  %1858 = vmatpush3.msra.mxu1 %v480_v26  ;;  %v2679_v25 = vld [vmem:[%s2870_s4 + $0x8] sm:$0xff]  ;;  %v2687_v26 = vld [vmem:[%s2870_s4] sm:$0xff] }
  0xcc   : > { %1958 = vmatprep.subr.mxu0 %v2325_v1  ;;  %1979 = vmatprep.subr.mxu1 %v2325_v1 }
  0xcd   : > { %2225 = vset.pattern.permute.xlu0 %v2333_v39 }
 0x16b   : > { %v475_v27 = vpop.f32.mrf.mxu0  ;;  %v583_v28 = vpop.f32.mrf.mxu1 }
 0x16d   : > { %v477_v29 = vpop.f32.mrf.mxu0  ;;  %v585_v30 = vpop.f32.mrf.mxu1 }
 0x16e   : > { %685 = vmatprep.mubr.f32.mxu0 %v585_v30  ;;  %755 = vmatprep.mubr.f32.mxu1 %v477_v29 }
 0x16f   : > { %686 = vmatmul.mubr.f32.vlgmr.msra.gmra.mxu0 %v583_v28  ;;  %756 = vmatmul.mubr.f32.vlgmr.msra.gmra.mxu1 %v475_v27 }
 0x170   : > { %1976 = vmatprep.mubr.msk.f32.mxu0 %vm2332_vm4, %v2325_v1  ;;  %2011 = vmatprep.mubr.msk.f32.mxu1 %vm2332_vm4, %v2325_v1 }
 0x171   : > { %1980 = vmatpush3.msra.mxu1 %v2495_v38 }
 0x172   : > { %1981 = vmatprep.subr.mxu1 %v2325_v1 }
 0x173   : > { %1982 = vmatpush3.msra.mxu1 %v2501_v40 }
 0x174   : > { %1983 = vmatprep.subr.mxu1 %v2325_v1 }
 0x175   : > { %1984 = vmatpush3.msra.mxu1 %v2512_v41 }
 0x176   : > { %1985 = vmatprep.subr.mxu1 %v2325_v1 }
 0x177   : > { %1986 = vmatpush3.msra.mxu1 %v2522_v42 }
 0x178   : > { %1987 = vmatprep.subr.mxu1 %v2325_v1 }
 0x179   : > { %1988 = vmatpush3.msra.mxu1 %v2532_v44 }
 0x17a   : > { %1989 = vmatprep.subr.mxu1 %v2325_v1 }
 0x17b   : > { %1990 = vmatpush3.msra.mxu1 %v2539_v45 }
 0x17c   : > { %1991 = vmatprep.subr.mxu1 %v2325_v1 }
 0x17d   : > { %1992 = vmatpush3.msra.mxu1 %v2546_v46 }
 0x17e   : > { %1993 = vmatprep.subr.mxu1 %v2325_v1 }
 0x17f   : > { %1994 = vmatpush3.msra.mxu1 %v2553_v47 }
 0x180   : > { %1995 = vmatprep.subr.mxu1 %v2325_v1 }
 0x181   : > { %1996 = vmatpush3.msra.mxu1 %v2560_v48 }
 0x182   : > { %1997 = vmatprep.subr.mxu1 %v2325_v1 }
 0x183   : > { %1998 = vmatpush3.msra.mxu1 %v2567_v49 }
 0x184   : > { %1999 = vmatprep.subr.mxu1 %v2325_v1 }
 0x185   : > { %2000 = vmatpush3.msra.mxu1 %v2574_v50 }
 0x186   : > { %2001 = vmatprep.subr.mxu1 %v2325_v1 }
 0x187   : > { %2002 = vmatpush3.msra.mxu1 %v2581_v51 }
 0x188   : > { %2003 = vmatprep.subr.mxu1 %v2325_v1 }
 0x189   : > { %2004 = vmatpush3.msra.mxu1 %v2588_v52 }
 0x18a   : > { %2005 = vmatprep.subr.mxu1 %v2325_v1 }
 0x18b   : > { %2006 = vmatpush3.msra.mxu1 %v2595_v53 }
 0x18c   : > { %2007 = vmatprep.subr.mxu1 %v2325_v1 }
 0x18d   : > { %2008 = vmatpush3.msra.mxu1 %v2679_v25 }
 0x18e   : > { %2009 = vmatprep.subr.mxu1 %v2325_v1 }
 0x18f   : > { %2010 = vmatpush3.msra.mxu1 %v2687_v26 }
 0x190   : > { %2049 = vmatprep.subr.mxu1 %v2325_v1 }
 0x22f   : > { %v1824_v31 = vpop.f32.mrf.mxu0  ;;  %v1859_v32 = vpop.f32.mrf.mxu1 }
 0x231   : > { %v1825_v33 = vpop.f32.mrf.mxu0  ;;  %v1860_v34 = vpop.f32.mrf.mxu1 }
 0x232   : > { %v1826_v35 = vadd.f32 %v1825_v33, %v1824_v31  ;;  %v1861_v36 = vadd.f32 %v1860_v34, %v1859_v32  ;;  %v1081_v32 = vld [vmem:[%s2871_s5] sm:$0x3] }
 0x234   : > { %v2478_v37 = vadd.f32 %v1861_v36, %v1826_v35 }
 0x236   : > { %812 = vrot.lane.b32.xlu1 %v2478_v37, %s2879_s20  ;;  %820 = vrot.lane.b32.xlu0 %v2478_v37, %s2330_s21 }
 0x23a   : > { %796 = vrot.lane.b32.xlu1 %v2478_v37, %s2878_s27  ;;  %804 = vrot.lane.b32.xlu0 %v2478_v37, %s2331_s26 }
 0x23e   : > { %779 = vrot.lane.b32.xlu1 %v2478_v37, %s2877_s11  ;;  %787 = vrot.lane.b32.xlu0 %v2478_v37, %s2335_s12  ;;  %s2883_s11 = smov 120  }
 0x242   : > { %763 = vrot.lane.b32.xlu1 %v2478_v37, %s2336_s25  ;;  %771 = vrot.lane.b32.xlu0 %v2478_v37, %s2337_s29 }
 0x246   : > { %841 = vperm.xlu0 %2225, %v838_v43  }
 0x2a8   : > { %v813_v61 = vpop.permute.xlu1 %812  ;;  %v821_v62 = vpop.permute.xlu0 %820 }
 0x2a9   : > { %v826_v63 = vmul.f32 %v2608_v58, %v821_v62  ;;  %v818_v3 = vmul.f32 %v2610_v59, %v813_v61 }
 0x2ab   : > { %1959 = vmatpush3.msra.mxu0 %v826_v63 }
 0x2ac   : > { %v797_v5 = vpop.permute.xlu1 %796  ;;  %1960 = vmatprep.subr.mxu0 %v2325_v1  ;;  %v805_v6 = vpop.permute.xlu0 %804 }
 0x2ad   : > { %v810_v7 = vmul.f32 %v2613_v0, %v805_v6  ;;  %1961 = vmatpush3.msra.mxu0 %v818_v3  ;;  %v802_v9 = vmul.f32 %v2616_v2, %v797_v5  ;;  %v1281_v6 = vld [vmem:[%s2875_s9] sm:$0xff] }
 0x2ae   : > { %1962 = vmatprep.subr.mxu0 %v2325_v1 }
 0x2af   : > { %1963 = vmatpush3.msra.mxu0 %v810_v7 }
 0x2b0   : > { %v780_v12 = vpop.permute.xlu1 %779  ;;  %1964 = vmatprep.subr.mxu0 %v2325_v1  ;;  %v788_v13 = vpop.permute.xlu0 %787 }
 0x2b1   : > { %1965 = vmatpush3.msra.mxu0 %v802_v9  ;;  %v793_v16 = vmul.f32 %v2622_v10, %v788_v13  ;;  %v785_v19 = vmul.f32 %v2625_v14, %v780_v12 }
 0x2b2   : > { %1966 = vmatprep.subr.mxu0 %v2325_v1 }
 0x2b3   : > { %1967 = vmatpush3.msra.mxu0 %v2478_v37 }
 0x2b4   : > { %1968 = vmatprep.subr.mxu0 %v2325_v1  ;;  %v772_v18 = vpop.permute.xlu0 %771  ;;  %v764_v21 = vpop.permute.xlu1 %763 }
 0x2b5   : > { %1969 = vmatpush3.msra.mxu0 %v793_v16  ;;  %v777_v22 = vmul.f32 %v2630_v17, %v772_v18  ;;  %v769_v23 = vmul.f32 %v2634_v20, %v764_v21 }
 0x2b6   : > { %1970 = vmatprep.subr.mxu0 %v2325_v1 }
 0x2b7   : > { %1971 = vmatpush3.msra.mxu0 %v785_v19 }
 0x2b8   : > { %1972 = vmatprep.subr.mxu0 %v2325_v1 }
 0x2b9   : > { %1973 = vmatpush3.msra.mxu0 %v777_v22 }
 0x2ba   : > { %1974 = vmatprep.subr.mxu0 %v2325_v1 }
 0x2bb   : > { %1975 = vmatpush3.msra.mxu0 %v769_v23 }
 0x2bc   : > { %1977 = vmatmul.mubr.msk.f32.vlgmr.msra.gmra.mxu0 %vm844_vm5, %v828_v24  ;;  %2014 = vmatprep.subr.mxu0 %v2325_v1 }
 0x2bd   : > { %2015 = vmatpush3.msra.mxu0 %v2495_v38  ;;  %2046 = vmatprep.mubr.msk.f32.mxu0 %vm2332_vm4, %v2325_v1 }
 0x2be   : > { %2016 = vmatprep.subr.mxu0 %v2325_v1 }
 0x2bf   : > { %2017 = vmatpush3.msra.mxu0 %v2501_v40 }
 0x2c0   : > { %2018 = vmatprep.subr.mxu0 %v2325_v1 }
 0x2c1   : > { %2019 = vmatpush3.msra.mxu0 %v2512_v41  ;;  %v842_v27 = vpop.permute.xlu0 %841 }
 0x2c2   : > { %2020 = vmatprep.subr.mxu0 %v2325_v1 }
 0x2c3   : > { %2021 = vmatpush3.msra.mxu0 %v2522_v42 }
 0x2c4   : > { %2022 = vmatprep.subr.mxu0 %v2325_v1 }
 0x2c5   : > { %2023 = vmatpush3.msra.mxu0 %v2532_v44 }
 0x2c6   : > { %2024 = vmatprep.subr.mxu0 %v2325_v1 }
 0x2c7   : > { %2025 = vmatpush3.msra.mxu0 %v2539_v45 }
 0x2c8   : > { %2026 = vmatprep.subr.mxu0 %v2325_v1 }
 0x2c9   : > { %2027 = vmatpush3.msra.mxu0 %v2546_v46 }
 0x2ca   : > { %2028 = vmatprep.subr.mxu0 %v2325_v1 }
 0x2cb   : > { %2029 = vmatpush3.msra.mxu0 %v2553_v47 }
 0x2cc   : > { %2030 = vmatprep.subr.mxu0 %v2325_v1 }
 0x2cd   : > { %2031 = vmatpush3.msra.mxu0 %v2560_v48 }
 0x2ce   : > { %2032 = vmatprep.subr.mxu0 %v2325_v1 }
 0x2cf   : > { %2033 = vmatpush3.msra.mxu0 %v2567_v49 }
 0x2d0   : > { %2034 = vmatprep.subr.mxu0 %v2325_v1 }
 0x2d1   : > { %2035 = vmatpush3.msra.mxu0 %v2574_v50 }
 0x2d2   : > { %2036 = vmatprep.subr.mxu0 %v2325_v1 }
 0x2d3   : > { %2037 = vmatpush3.msra.mxu0 %v2581_v51 }
 0x2d4   : > { %2038 = vmatprep.subr.mxu0 %v2325_v1 }
 0x2d5   : > { %2039 = vmatpush3.msra.mxu0 %v2588_v52 }
 0x2d6   : > { %2040 = vmatprep.subr.mxu0 %v2325_v1 }
 0x2d7   : > { %2041 = vmatpush3.msra.mxu0 %v2595_v53 }
 0x2d8   : > { %2042 = vmatprep.subr.mxu0 %v2325_v1 }
 0x2d9   : > { %2043 = vmatpush3.msra.mxu0 %v2679_v25 }
 0x2da   : > { %2044 = vmatprep.subr.mxu0 %v2325_v1 }
 0x2db   : > { %2045 = vmatpush3.msra.mxu0 %v2687_v26 }
 0x2dc   : > { %2080 = vmatprep.subr.mxu0 %v2325_v1 }
 0x37c   : > { %v914_v28 = vpop.f32.mrf.mxu0 }
 0x37d   : > { %v2694_v29 = vadd.f32 %v914_v28, %v842_v27 }
 0x37e   : > { %v1978_v30 = vpop.f32.mrf.mxu0 }
 0x37f   : > { %v1004_v31 = vmul.f32 %v2694_v29, %v2694_v29  ;;  %2012 = vmatmul.mubr.f32.vlgmr.msra.gmra.mxu1 %v2694_v29 }
 0x380   : > { %2051 = vmatprep.mubr.msk.f32.mxu1 %vm2332_vm4, %v2325_v1  ;;  %2050 = vmatpush3.msk.msra.mxu1 %vm1086_vm6, %v1081_v32 }
 0x381   : > { %2047 = vmatmul.mubr.f32.vlgmr.msra.gmra.mxu0 %v1004_v31  ;;  %2054 = vmatprep.subr.mxu1 %v2325_v1 }
 0x382   : > { %2081 = vmatpush3.msra.mxu0 %v2495_v38  ;;  %2112 = vmatprep.mubr.msk.f32.mxu0 %vm2332_vm4, %v2325_v1 }
 0x383   : > { %2082 = vmatprep.subr.mxu0 %v2325_v1 }
 0x384   : > { %2083 = vmatpush3.msra.mxu0 %v2501_v40 }
 0x385   : > { %2084 = vmatprep.subr.mxu0 %v2325_v1 }
 0x386   : > { %2085 = vmatpush3.msra.mxu0 %v2512_v41 }
 0x387   : > { %2086 = vmatprep.subr.mxu0 %v2325_v1 }
 0x388   : > { %2087 = vmatpush3.msra.mxu0 %v2522_v42 }
 0x389   : > { %2088 = vmatprep.subr.mxu0 %v2325_v1 }
 0x38a   : > { %2089 = vmatpush3.msra.mxu0 %v2532_v44 }
 0x38b   : > { %2090 = vmatprep.subr.mxu0 %v2325_v1 }
 0x38c   : > { %2091 = vmatpush3.msra.mxu0 %v2539_v45 }
 0x38d   : > { %2092 = vmatprep.subr.mxu0 %v2325_v1 }
 0x38e   : > { %2093 = vmatpush3.msra.mxu0 %v2546_v46 }
 0x38f   : > { %2094 = vmatprep.subr.mxu0 %v2325_v1 }
 0x390   : > { %2095 = vmatpush3.msra.mxu0 %v2553_v47 }
 0x391   : > { %2096 = vmatprep.subr.mxu0 %v2325_v1 }
 0x392   : > { %2097 = vmatpush3.msra.mxu0 %v2560_v48 }
 0x393   : > { %2098 = vmatprep.subr.mxu0 %v2325_v1 }
 0x394   : > { %2099 = vmatpush3.msra.mxu0 %v2567_v49 }
 0x395   : > { %2100 = vmatprep.subr.mxu0 %v2325_v1 }
 0x396   : > { %2101 = vmatpush3.msra.mxu0 %v2574_v50 }
 0x397   : > { %2102 = vmatprep.subr.mxu0 %v2325_v1 }
 0x398   : > { %2103 = vmatpush3.msra.mxu0 %v2581_v51 }
 0x399   : > { %2104 = vmatprep.subr.mxu0 %v2325_v1 }
 0x39a   : > { %2105 = vmatpush3.msra.mxu0 %v2588_v52 }
 0x39b   : > { %2106 = vmatprep.subr.mxu0 %v2325_v1 }
 0x39c   : > { %2107 = vmatpush3.msra.mxu0 %v2595_v53 }
 0x39d   : > { %2108 = vmatprep.subr.mxu0 %v2325_v1 }
 0x39e   : > { %2109 = vmatpush3.msra.mxu0 %v2679_v25 }
 0x39f   : > { %2110 = vmatprep.subr.mxu0 %v2325_v1 }
 0x3a0   : > { %2111 = vmatpush3.msra.mxu0 %v2687_v26 }
 0x3a1   : > { %2150 = vmatprep.subr.mxu0 %v2325_v1 }
 0x43f   : > { %v1000_v33 = vpop.f32.mrf.mxu1 }
 0x440   : > { %v1075_v34 = vmul.f32 0.015625, %v1000_v33 }
 0x441   : > { %v2013_v35 = vpop.f32.mrf.mxu1  ;;  %v1071_v36 = vpop.f32.mrf.mxu0 }
 0x442   : > { %v1077_v37 = vmul.f32 %v1075_v34, %v1075_v34  ;;  %v1076_v39 = vmul.f32 0.015625, %v1071_v36  ;;  %2052 = vmatmul.mubr.msk.f32.vlgmr.msra.gmra.mxu1 %vm1082_vm7, %v1075_v34 }
 0x443   : > { %v2048_v43 = vpop.f32.mrf.mxu0  ;;  %2055 = vmatpush3.msk.msra.mxu1 %vm1086_vm6, %v1081_v32  ;;  %2056 = vmatprep.mubr.msk.f32.mxu1 %vm2332_vm4, %v2325_v1 }
 0x444   : > { %v1078_v54 = vsub.f32 %v1076_v39, %v1077_v37  ;;  %2059 = vmatprep.subr.mxu1 %v2325_v1 }
 0x446   : > { %v1079_v55 = vadd.f32 1e-05, %v1078_v54 }
 0x448   : > { %2226 = vrsqrt.f32 %v1079_v55 }
 0x455   : > { %v2227_v56 = vpop.eup %2226 }
 0x456   : > { %2057 = vmatmul.mubr.msk.f32.vlgmr.msra.gmra.mxu1 %vm1082_vm7, %v2227_v56 }
 0x457   : > { %2077 = vmatprep.mubr.msk.f32.mxu1 %vm2332_vm4, %v2325_v1 }
 0x502   : > { %v1156_v57 = vpop.f32.mrf.mxu1 }
 0x503   : > { %v1233_v61 = vsub.f32 %v2694_v29, %v1156_v57 }
 0x504   : > { %v2053_v60 = vpop.f32.mrf.mxu1 }
 0x516   : > { %v1229_v62 = vpop.f32.mrf.mxu1 }
 0x517   : > { %v1234_v63 = vmul.f32 %v1233_v61, %v1229_v62 }
 0x518   : > { %v2058_v3 = vpop.f32.mrf.mxu1 }
 0x519   : > { %vm1235_vm8 = vcmp.ge.f32.partialorder %v1234_v63, 0.0  ;;  %v1236_v4 = vmul.f32 0.2, %v1234_v63 }
 0x51b   : > { %v1237_v5 = vsel %vm1235_vm8, %v1234_v63, %v1236_v4 }
 0x51c   : > { %1259 = vrot.lane.b32.xlu0 %v1237_v5, %s2331_s26  ;;  %1267 = vrot.lane.b32.xlu1 %v1237_v5, %s2330_s21 }
 0x520   : > { %1250 = vrot.lane.b32.xlu0 %v1237_v5, %s2335_s12  ;;  %1263 = vrot.lane.b32.xlu1 %v1237_v5, %s2883_s11  ;;  %s1788_s11 = sshll.u32 %s2415_s17, 7  ;;  %s2338_s17 = smov [#allocation7]  }
 0x521   : > { %s2831_s21 = scalar_lea.hbm %s2876_s10, %s1788_s11 }
 0x524   : > { %1242 = vrot.lane.b32.xlu0 %v1237_v5, %s2337_s29  ;;  %1255 = vrot.lane.b32.xlu1 %v1237_v5, %s2884_s30  ;;  %s365_s29 = sand.u32 1, %s2312_s14  }
 0x525   : > { %s1770_s28 = sshll.u32 %s365_s29, 3  ;;  %s1680_s26 = scalar_lea.sflag [#allocation6], %s365_s29 }
 0x526   : > { %s367_s30 = scalar_lea.vmem [#allocation7], %s1770_s28 }
 0x527   : > { %s1693_s27 = sshll.u32 %s367_s30, 4  ;;  %s1694_s27 = int_to_ptr.vmem [resolvable:$true] %s1693_s27 }
 0x528   : > { %1284 = vperm.xlu0 %2225, %v1281_v6   ;;  %1246 = vrot.lane.b32.xlu1 %v1237_v5, %s2885_s18  ;;  %s2256_s12 = scalar_lea.vmem %s1694_s27, 128 }
 0x529   : > { %p2257_p6 = scmp.ne.s32.totalorder %s1694_s27, %s2256_s12 }
 0x52b   : > { %p2258_p9 = pnand %p2257_p6, %p2432_p5 }
 0x52c   : > { %1238 = vrot.lane.b32.xlu1 %v1237_v5, %s2336_s25  ;;  %s2260_s25 = sshll.u32 %s2338_s17, 4  ;;  %s2261_s25 = int_to_ptr.vmem [resolvable:$false] %s2260_s25 }
 0x52d   : > { %p2259_p10 = pneg %p2258_p9  ;;  %s2262_s28 = scalar_lea.vmem %s2261_s25, 256 }
 0x52e   : > { %p2263_p11 = scmp.lt.s32.totalorder %s1694_s27, %s2261_s25  ;;  %p2264_p12 = scmp.lt.s32.totalorder %s2262_s28, %s2256_s12 }
 0x530   : > { %p2265_p13 = por %p2264_p12, %p2263_p11 }
 0x532   : > { %p2266_p0 = pnand %p2265_p13, %p2259_p10 }
 0x58e   : > { %v1268_v7 = vpop.permute.xlu1 %1267  ;;  %v1260_v9 = vpop.permute.xlu0 %1259 }
 0x58f   : > { %v1269_v8 = vmul.f32 %v2608_v58, %v1268_v7  ;;  %v1261_v13 = vmul.f32 %v1260_v9, %v2613_v0 }
 0x591   : > { %2060 = vmatpush3.msra.mxu1 %v1269_v8 }
 0x592   : > { %v1264_v11 = vpop.permute.xlu1 %1263  ;;  %2061 = vmatprep.subr.mxu1 %v2325_v1  ;;  %v1251_v15 = vpop.permute.xlu0 %1250 }
 0x593   : > { %v1265_v12 = vmul.f32 %v1264_v11, %v2610_v59  ;;  %v1252_v19 = vmul.f32 %v1251_v15, %v2622_v10  ;;  %v1271_v10 = vld [vmem:[%s2874_s8] sm:$0xff] }
 0x595   : > { %2062 = vmatpush3.msra.mxu1 %v1265_v12 }
 0x596   : > { %2063 = vmatprep.subr.mxu1 %v2325_v1  ;;  %v1256_v16 = vpop.permute.xlu1 %1255  ;;  %v1243_v59 = vpop.permute.xlu0 %1242 }
 0x597   : > { %v1257_v18 = vmul.f32 %v1256_v16, %v2616_v2  ;;  %2064 = vmatpush3.msra.mxu1 %v1261_v13  ;;  %v1244_v2 = vmul.f32 %v1243_v59, %v2630_v17 }
 0x598   : > { %2065 = vmatprep.subr.mxu1 %v2325_v1 }
 0x599   : > { %2066 = vmatpush3.msra.mxu1 %v1257_v18 }
 0x59a   : > { %2067 = vmatprep.subr.mxu1 %v2325_v1  ;;  %v1247_v58 = vpop.permute.xlu1 %1246 }
 0x59b   : > { %2068 = vmatpush3.msra.mxu1 %v1237_v5  ;;  %v1248_v0 = vmul.f32 %v1247_v58, %v2625_v14 }
 0x59c   : > { %2069 = vmatprep.subr.mxu1 %v2325_v1 }
 0x59d   : > { %2070 = vmatpush3.msra.mxu1 %v1252_v19 }
 0x59e   : > { %2071 = vmatprep.subr.mxu1 %v2325_v1  ;;  %v1239_v21 = vpop.permute.xlu1 %1238 }
 0x59f   : > { %2072 = vmatpush3.msra.mxu1 %v1248_v0  ;;  %v1240_v22 = vmul.f32 %v1239_v21, %v2634_v20 }
 0x5a0   : > { %2073 = vmatprep.subr.mxu1 %v2325_v1 }
 0x5a1   : > { %2074 = vmatpush3.msra.mxu1 %v1244_v2 }
 0x5a2   : > { %2075 = vmatprep.subr.mxu1 %v2325_v1 }
 0x5a3   : > { %2076 = vmatpush3.msra.mxu1 %v1240_v22 }
 0x5a4   : > { %2078 = vmatmul.mubr.msk.f32.vlgmr.msra.gmra.mxu1 %vm844_vm5, %v1271_v10  ;;  %2115 = vmatprep.subr.mxu1 %v2325_v1 }
 0x5a5   : > { %2116 = vmatpush3.msra.mxu1 %v2495_v38  ;;  %2147 = vmatprep.mubr.msk.f32.mxu1 %vm2332_vm4, %v2325_v1  ;;  %v1285_v38 = vpop.permute.xlu0 %1284 }
 0x5a6   : > { %2117 = vmatprep.subr.mxu1 %v2325_v1 }
 0x5a7   : > { %2118 = vmatpush3.msra.mxu1 %v2501_v40 }
 0x5a8   : > { %2119 = vmatprep.subr.mxu1 %v2325_v1 }
 0x5a9   : > { %2120 = vmatpush3.msra.mxu1 %v2512_v41 }
 0x5aa   : > { %2121 = vmatprep.subr.mxu1 %v2325_v1 }
 0x5ab   : > { %2122 = vmatpush3.msra.mxu1 %v2522_v42 }
 0x5ac   : > { %2123 = vmatprep.subr.mxu1 %v2325_v1 }
 0x5ad   : > { %2124 = vmatpush3.msra.mxu1 %v2532_v44 }
 0x5ae   : > { %2125 = vmatprep.subr.mxu1 %v2325_v1 }
 0x5af   : > { %2126 = vmatpush3.msra.mxu1 %v2539_v45  ;;  %v1523_v45 = vld [vmem:[%s2871_s5] sm:$0x3] }
 0x5b0   : > { %2127 = vmatprep.subr.mxu1 %v2325_v1 }
 0x5b1   : > { %2128 = vmatpush3.msra.mxu1 %v2546_v46 }
 0x5b2   : > { %2129 = vmatprep.subr.mxu1 %v2325_v1 }
 0x5b3   : > { %2130 = vmatpush3.msra.mxu1 %v2553_v47 }
 0x5b4   : > { %2131 = vmatprep.subr.mxu1 %v2325_v1 }
 0x5b5   : > { %2132 = vmatpush3.msra.mxu1 %v2560_v48 }
 0x5b6   : > { %2133 = vmatprep.subr.mxu1 %v2325_v1 }
 0x5b7   : > { %2134 = vmatpush3.msra.mxu1 %v2567_v49 }
 0x5b8   : > { %2135 = vmatprep.subr.mxu1 %v2325_v1 }
 0x5b9   : > { %2136 = vmatpush3.msra.mxu1 %v2574_v50 }
 0x5ba   : > { %2137 = vmatprep.subr.mxu1 %v2325_v1 }
 0x5bb   : > { %2138 = vmatpush3.msra.mxu1 %v2581_v51 }
 0x5bc   : > { %2139 = vmatprep.subr.mxu1 %v2325_v1 }
 0x5bd   : > { %2140 = vmatpush3.msra.mxu1 %v2588_v52 }
 0x5be   : > { %2141 = vmatprep.subr.mxu1 %v2325_v1 }
 0x5bf   : > { %2142 = vmatpush3.msra.mxu1 %v2595_v53 }
 0x5c0   : > { %2143 = vmatprep.subr.mxu1 %v2325_v1 }
 0x5c1   : > { %2144 = vmatpush3.msra.mxu1 %v2679_v25 }
 0x5c2   : > { %2145 = vmatprep.subr.mxu1 %v2325_v1 }
 0x5c3   : > { %2146 = vmatpush3.msra.mxu1 %v2687_v26 }
 0x664   : > { %v1356_v40 = vpop.f32.mrf.mxu1 }
 0x665   : > { %v1357_v41 = vadd.f32 %v1356_v40, %v1285_v38 }
 0x666   : > { %v2079_v42 = vpop.f32.mrf.mxu1 }
 0x667   : > { %v1446_v44 = vmul.f32 %v1357_v41, %v1357_v41  ;;  %2113 = vmatmul.mubr.f32.vlgmr.msra.gmra.mxu0 %v1357_v41 }
 0x668   : > { %2152 = vmatprep.mubr.msk.f32.mxu0 %vm2332_vm4, %v2325_v1  ;;  %2151 = vmatpush3.msk.msra.mxu0 %vm1086_vm6, %v1523_v45 }
 0x669   : > { %2148 = vmatmul.mubr.f32.vlgmr.msra.gmra.mxu1 %v1446_v44  ;;  %2155 = vmatprep.subr.mxu0 %v2325_v1 }
 0x727   : > { %v1442_v46 = vpop.f32.mrf.mxu0 }
 0x728   : > { %v1517_v47 = vmul.f32 0.015625, %v1442_v46 }
 0x729   : > { %v2114_v48 = vpop.f32.mrf.mxu0  ;;  %v1513_v49 = vpop.f32.mrf.mxu1 }
 0x72a   : > { %v1519_v50 = vmul.f32 %v1517_v47, %v1517_v47  ;;  %v1518_v51 = vmul.f32 0.015625, %v1513_v49  ;;  %2153 = vmatmul.mubr.msk.f32.vlgmr.msra.gmra.mxu0 %vm1082_vm7, %v1517_v47 }
 0x72b   : > { %v2149_v52 = vpop.f32.mrf.mxu1  ;;  %2156 = vmatpush3.msk.msra.mxu0 %vm1086_vm6, %v1523_v45  ;;  %2157 = vmatprep.mubr.msk.f32.mxu0 %vm2332_vm4, %v2325_v1 }
 0x72c   : > { %v1520_v53 = vsub.f32 %v1518_v51, %v1519_v50 }
 0x72e   : > { %v1521_v14 = vadd.f32 1e-05, %v1520_v53 }
 0x730   : > { %2228 = vrsqrt.f32 %v1521_v14 }
 0x73d   : > { %v2229_v17 = vpop.eup %2228 }
 0x73e   : > { %2158 = vmatmul.mubr.msk.f32.vlgmr.msra.gmra.mxu0 %vm1082_vm7, %v2229_v17 }
 0x7ea   : > { %v1596_v20 = vpop.f32.mrf.mxu0 }
 0x7eb   : > { %v1673_v24 = vsub.f32 %v1357_v41, %v1596_v20 }
 0x7ec   : > { %v2154_v23 = vpop.f32.mrf.mxu0 }
 0x7fe   : > { %v1669_v25 = vpop.f32.mrf.mxu0 }
 0x7ff   : > { %v1674_v26 = vmul.f32 %v1673_v24, %v1669_v25 }
 0x800   : > { %v2159_v27 = vpop.f32.mrf.mxu0 }
 0x801   : > { %vm1675_vm9 = vcmp.ge.f32.partialorder %v1674_v26, 0.0  ;;  %v1676_v1 = vmul.f32 0.2, %v1674_v26 }
 0x803   : > { %v1677_v28 = vsel %vm1675_vm9, %v1674_v26, %v1676_v1 }
 0x804   : > { %1678 = vst [vmem:[%s367_s30] sm:$0xff] %v1677_v28 }
 0x805   : > { %2269 = shalt.err (!%p2266_p0)
}
 0x806   : > { %s2270_s11 = scalar_lea.hbm %s2831_s21, 128  ;;  %s2274_s20 = scalar_lea.hbm %s2876_s10, 256 }
 0x807   : > { %p2271_p1 = scmp.ne.s32.totalorder %s2831_s21, %s2270_s11  ;;  %p2275_p4 = scmp.lt.s32.totalorder %s2831_s21, %s2876_s10 }
 0x808   : > { %p2276_p7 = scmp.lt.s32.totalorder %s2274_s20, %s2270_s11 }
 0x809   : > { %p2272_p2 = pnand %p2271_p1, %p2432_p5 }
 0x80a   : > { %p2277_p8 = por %p2276_p7, %p2275_p4 }
 0x80b   : > { %p2273_p3 = pneg %p2272_p2 }
 0x80d   : > { %p2278_p6 = pnand %p2277_p8, %p2273_p3 }
 0x80f   : > { %2281 = shalt.err (!%p2278_p6)
}
 0x810   : > { %2164 = dma.vmem_to_hbm [thread:$0]  (%p2432_p5), %s1694_s27, 128, %s2831_s21, %s1680_s26  }
 0x811 PF: > { %p2176_p9 = scmp.ge.s32.totalorder %s2320_s16, 2  ;;  %s1705_s12 = sand.u32 1, %s2308_s13  }
 0x812   : > { %p2886_p10 = scmp.ne.s32.totalorder %s2881_s24, 0  ;;  %s1706_s25 = scalar_lea.sflag [#allocation6], %s1705_s12 }
 0x814   : > { %p2171_p11 = pnand %p2176_p9, %p2886_p10 }
 0x816   : > { %p2172_p12 = pneg %p2171_p11 }
 0x818   : > { %2303 = dma.done.wait (%p2172_p12), %s1706_s25, 128  }
 0x819   : > { %2305 = vsyncadd (%p2172_p12), %s1706_s25, 4294967168  ;;  %p21_p13 = scmp.ge.s32.totalorder %s2419_s19, 4   ;;  %s2887_s13 = smov %s2312_s14 }
 0x81a   : > { %s2888_s14 = smov %s2316_s15  ;;  %s2889_s15 = smov %s2430_s22 }
 0x81b   : > { %s2890_s16 = smov %s2419_s19  ;;  %23 = sbr.rel (!%p21_p13) target bundleno = 4 (0x4), region = 102 }
 0x820   :  { %1711 = vsyncpa [#allocation5], 1 }
 0x821   :  { %1713 = vsyncpa [#allocation5 + $0x1], 1 }
 0x822   :  { %1714 = vsyncpa [#allocation6], 1 }
 0x823   :  { %1716 = vsyncpa [#allocation6 + $0x1], 1 }

</bundles_post_ra>
